<compile_context>
chip_gen: v5e
topology: v5e:2x2
jax: 0.10.0
libtpu: 0.0.40
codegen_flags: <defaults>
</compile_context>

<pallas_src>
import math

import jax
import jax.numpy as jnp
from jax.experimental import pallas as pl
from jax.experimental.pallas import tpu as pltpu


# ----------------------------------------------------------------------------
# In-kernel helpers
# ----------------------------------------------------------------------------
def _group_norm_2d(x2d, gamma, beta, a, at, eps):
    """GroupNorm on a (P, C) f32 block.

    gamma/beta: (1, C); a: (C, G) one-hot channel->group; at: (G, C) group->channel.
    Group aggregation done with tiny MXU matmuls (robust lowering, any group size).
    """
    p = x2d.shape[0]
    c = a.shape[0]
    g = a.shape[1]
    cnt = float(p * (c // g))
    s1 = jnp.sum(x2d, axis=0, keepdims=True)                 # (1, C)
    s2 = jnp.sum(x2d * x2d, axis=0, keepdims=True)           # (1, C)
    gm = jnp.dot(s1, a, preferred_element_type=jnp.float32) / cnt    # (1, G) mean
    gm2 = jnp.dot(s2, a, preferred_element_type=jnp.float32) / cnt   # (1, G) E[x^2]
    gv = gm2 - gm * gm                                                # biased var
    mean_c = jnp.dot(gm, at, preferred_element_type=jnp.float32)      # (1, C)
    var_c = jnp.dot(gv, at, preferred_element_type=jnp.float32)       # (1, C)
    inv = jax.lax.rsqrt(var_c + eps)
    return (x2d - mean_c) * inv * gamma + beta


def _swish(x):
    return x * (1.0 / (1.0 + jnp.exp(-x)))


def _group_onehot(c, groups):
    gs = c // groups
    a = (jnp.arange(c)[:, None] // gs == jnp.arange(groups)[None, :]).astype(jnp.float32)
    return a, jnp.transpose(a)                                # (C, G), (G, C)


# ----------------------------------------------------------------------------
# Fused [GroupNorm -> swish ->] 3x3 same conv [-> + residual] kernel
# ----------------------------------------------------------------------------
def _make_gn_swish_conv3x3_kernel(H, W, Ci, Co, apply_gn, add_res, eps):
    def kernel(*refs):
        it = iter(refs)
        x_ref = next(it)
        if apply_gn:
            gamma_ref = next(it); beta_ref = next(it)
            a_ref = next(it); at_ref = next(it)
        w_ref = next(it); b_ref = next(it)
        res_ref = next(it) if add_res else None
        o_ref = next(it)
        xp_ref = next(it)                                     # (H+2, W+2, Ci) VMEM scratch

        x = x_ref[...].astype(jnp.float32)                    # (H, W, Ci)
        if apply_gn:
            h2 = _group_norm_2d(x.reshape(H * W, Ci), gamma_ref[...], beta_ref[...],
                                a_ref[...], at_ref[...], eps)
            h = _swish(h2).reshape(H, W, Ci)
        else:
            h = x

        # zero-bordered activation buffer kept in VMEM: padding handled in-kernel.
        xp_ref[...] = jnp.zeros_like(xp_ref)
        xp_ref[pl.ds(1, H), pl.ds(1, W), :] = h

        acc = jnp.zeros((H * W, Co), jnp.float32)
        for dy in range(3):
            for dx in range(3):
                slab = xp_ref[pl.ds(dy, H), pl.ds(dx, W), :]          # (H, W, Ci)
                acc = acc + jnp.dot(slab.reshape(H * W, Ci),
                                    w_ref[3 * dy + dx],
                                    preferred_element_type=jnp.float32)
        acc = acc + b_ref[...]                                         # (1, Co) broadcast
        out = acc.reshape(H, W, Co)
        if add_res:
            out = out + res_ref[...].astype(jnp.float32)
        o_ref[...] = out.astype(o_ref.dtype)

    return kernel


def conv3x3_gn_swish_pallas(x_nhwc, w_oihw, bias, gamma=None, beta=None,
                            residual=None, groups=32, eps=1e-6):
    B, H, W, Ci = x_nhwc.shape
    Co = w_oihw.shape[0]
    apply_gn = gamma is not None
    add_res = residual is not None

    w9 = jnp.transpose(w_oihw, (2, 3, 1, 0)).reshape(9, Ci, Co)   # tap = 3*dy + dx
    b2 = bias.reshape(1, Co).astype(jnp.float32)

    inputs = [x_nhwc]
    in_specs = [pl.BlockSpec((None, H, W, Ci), lambda b: (b, 0, 0, 0))]
    if apply_gn:
        a, at = _group_onehot(Ci, groups)
        inputs += [gamma.reshape(1, Ci).astype(jnp.float32),
                   beta.reshape(1, Ci).astype(jnp.float32), a, at]
        in_specs += [pl.BlockSpec((1, Ci), lambda b: (0, 0)),
                     pl.BlockSpec((1, Ci), lambda b: (0, 0)),
                     pl.BlockSpec((Ci, groups), lambda b: (0, 0)),
                     pl.BlockSpec((groups, Ci), lambda b: (0, 0))]
    inputs += [w9, b2]
    in_specs += [pl.BlockSpec((9, Ci, Co), lambda b: (0, 0, 0)),
                 pl.BlockSpec((1, Co), lambda b: (0, 0))]
    if add_res:
        inputs.append(residual)
        in_specs.append(pl.BlockSpec((None, H, W, Co), lambda b: (b, 0, 0, 0)))

    kernel = _make_gn_swish_conv3x3_kernel(H, W, Ci, Co, apply_gn, add_res, eps)
    return pl.pallas_call(
        kernel,
        out_shape=jax.ShapeDtypeStruct((B, H, W, Co), x_nhwc.dtype),
        grid=(B,),
        in_specs=in_specs,
        out_specs=pl.BlockSpec((None, H, W, Co), lambda b: (b, 0, 0, 0)),
        scratch_shapes=[pltpu.VMEM((H + 2, W + 2, Ci), jnp.float32)],
        compiler_params=pltpu.CompilerParams(dimension_semantics=("parallel",)),
    )(*inputs)


def resnet_block_pallas(x_nhwc, p, groups=32, eps=1e-6):
    h = conv3x3_gn_swish_pallas(x_nhwc, p["w1"], p["bb1"],
                                gamma=p["g1"], beta=p["b1"], groups=groups, eps=eps)
    return conv3x3_gn_swish_pallas(h, p["w2"], p["bb2"],
                                   gamma=p["g2"], beta=p["b2"],
                                   residual=x_nhwc, groups=groups, eps=eps)


# ----------------------------------------------------------------------------
# Nearest-neighbor interpolation to arbitrary size (torch F.interpolate 'nearest'):
# src = floor(dst * in / out). Rows picked in the index_map (no compute); columns
# selected with a one-hot MXU matmul (no gather needed).
# ----------------------------------------------------------------------------
def _interp_row_kernel(x_ref, s_ref, o_ref):
    # x_ref: (W, C) source row; s_ref: (OW, W) one-hot; o_ref: (OW, C)
    o_ref[...] = jnp.dot(s_ref[...], x_ref[...].astype(jnp.float32),
                         preferred_element_type=jnp.float32).astype(o_ref.dtype)


def interpolate_nearest_pallas(x_nhwc, oh, ow):
    B, H, W, C = x_nhwc.shape
    cols = (jnp.arange(ow) * W) // ow
    sel = (cols[:, None] == jnp.arange(W)[None, :]).astype(jnp.float32)   # (OW, W)
    return pl.pallas_call(
        _interp_row_kernel,
        out_shape=jax.ShapeDtypeStruct((B, oh, ow, C), x_nhwc.dtype),
        grid=(B, oh),
        in_specs=[pl.BlockSpec((None, None, W, C),
                               lambda b, i: (b, (i * H) // oh, 0, 0)),
                  pl.BlockSpec((ow, W), lambda b, i: (0, 0))],
        out_specs=pl.BlockSpec((None, None, ow, C), lambda b, i: (b, i, 0, 0)),
        compiler_params=pltpu.CompilerParams(
            dimension_semantics=("parallel", "parallel")),
    )(x_nhwc, sel)


# ----------------------------------------------------------------------------
# Fused AttentionBlock kernel (per batch element)
# ----------------------------------------------------------------------------
def _make_attn_kernel(N, C, eps, scale):
    def kernel(x_ref, gamma_ref, beta_ref, a_ref, at_ref,
               wq_ref, bq_ref, wk_ref, bk_ref, wv_ref, bv_ref,
               wp_ref, bp_ref, o_ref):
        x = x_ref[...].astype(jnp.float32)                               # (N, C)
        xn = _group_norm_2d(x, gamma_ref[...], beta_ref[...],
                            a_ref[...], at_ref[...], eps)
        q = jnp.dot(xn, wq_ref[...], preferred_element_type=jnp.float32) + bq_ref[...]
        k = jnp.dot(xn, wk_ref[...], preferred_element_type=jnp.float32) + bk_ref[...]
        v = jnp.dot(xn, wv_ref[...], preferred_element_type=jnp.float32) + bv_ref[...]
        s = jax.lax.dot_general(q, k, (((1,), (1,)), ((), ())),
                                preferred_element_type=jnp.float32) * scale   # (N, N)
        s = s - jnp.max(s, axis=-1, keepdims=True)
        p = jnp.exp(s)
        p = p / jnp.sum(p, axis=-1, keepdims=True)
        o = jnp.dot(p, v, preferred_element_type=jnp.float32)                 # (N, C)
        o = jnp.dot(o, wp_ref[...], preferred_element_type=jnp.float32) + bp_ref[...]
        o_ref[...] = (x + o).astype(o_ref.dtype)

    return kernel


def attention_block_pallas(x_nhwc, p, groups=32, eps=1e-6):
    B, H, W, C = x_nhwc.shape
    N = H * W
    scale = float(C) ** (-0.5)
    xf = x_nhwc.reshape(B, N, C)
    a, at = _group_onehot(C, groups)

    def mat(w):      # (Cout, Cin) -> (Cin, Cout) so that y = x @ W
        return jnp.transpose(w, (1, 0)).astype(jnp.float32)

    def vec(b):
        return b.reshape(1, C).astype(jnp.float32)

    def full2(r, c):
        return pl.BlockSpec((r, c), lambda b: (0, 0))

    out = pl.pallas_call(
        _make_attn_kernel(N, C, eps, scale),
        out_shape=jax.ShapeDtypeStruct((B, N, C), x_nhwc.dtype),
        grid=(B,),
        in_specs=[pl.BlockSpec((None, N, C), lambda b: (b, 0, 0)),
                  full2(1, C), full2(1, C), full2(C, groups), full2(groups, C),
                  full2(C, C), full2(1, C), full2(C, C), full2(1, C),
                  full2(C, C), full2(1, C), full2(C, C), full2(1, C)],
        out_specs=pl.BlockSpec((None, N, C), lambda b: (b, 0, 0)),
        compiler_params=pltpu.CompilerParams(dimension_semantics=("parallel",)),
    )(xf, vec(p["norm_g"]), vec(p["norm_b"]), a, at,
      mat(p["q_w"]), vec(p["q_b"]), mat(p["k_w"]), vec(p["k_b"]),
      mat(p["v_w"]), vec(p["v_b"]), mat(p["proj_w"]), vec(p["proj_b"]))
    return out.reshape(B, H, W, C)


# ----------------------------------------------------------------------------
# 1x1 conv (conv_out) as a pointwise matmul kernel
# ----------------------------------------------------------------------------
def _pointwise_conv_kernel(x_ref, w_ref, b_ref, o_ref):
    o = jnp.dot(x_ref[...].astype(jnp.float32), w_ref[...],
                preferred_element_type=jnp.float32) + b_ref[...]
    o_ref[...] = o.astype(o_ref.dtype)


def conv1x1_pallas(x_nhwc, w_oc_ic, bias):
    B, H, W, Ci = x_nhwc.shape
    Co = w_oc_ic.shape[0]
    N = H * W
    xf = x_nhwc.reshape(B, N, Ci)
    out = pl.pallas_call(
        _pointwise_conv_kernel,
        out_shape=jax.ShapeDtypeStruct((B, N, Co), x_nhwc.dtype),
        grid=(B,),
        in_specs=[pl.BlockSpec((None, N, Ci), lambda b: (b, 0, 0)),
                  pl.BlockSpec((Ci, Co), lambda b: (0, 0)),
                  pl.BlockSpec((1, Co), lambda b: (0, 0))],
        out_specs=pl.BlockSpec((None, N, Co), lambda b: (b, 0, 0)),
        compiler_params=pltpu.CompilerParams(dimension_semantics=("parallel",)),
    )(xf, jnp.transpose(w_oc_ic, (1, 0)).astype(jnp.float32),
      bias.reshape(1, Co).astype(jnp.float32))
    return out.reshape(B, H, W, Co)


# ----------------------------------------------------------------------------
# Parameter init (mimics nn.Conv2d / nn.GroupNorm defaults, with small random
# gamma/beta perturbations so the affine path is exercised)
# ----------------------------------------------------------------------------
def _conv_params(key, cout, cin, ksize):
    fan_in = cin * ksize * ksize
    bound = 1.0 / math.sqrt(fan_in)
    kw, kb = jax.random.split(key)
    if ksize == 1:
        w = jax.random.uniform(kw, (cout, cin), jnp.float32, -bound, bound)
    else:
        w = jax.random.uniform(kw, (cout, cin, ksize, ksize), jnp.float32, -bound, bound)
    b = jax.random.uniform(kb, (cout,), jnp.float32, -bound, bound)
    return w, b


def _gn_params(key, c):
    kg, kb = jax.random.split(key)
    gamma = 1.0 + 0.05 * jax.random.normal(kg, (c,), jnp.float32)
    beta = 0.05 * jax.random.normal(kb, (c,), jnp.float32)
    return gamma, beta


def _resblock_params(key, c):
    k1, k2, k3, k4 = jax.random.split(key, 4)
    g1, b1 = _gn_params(k1, c)
    w1, bb1 = _conv_params(k2, c, c, 3)
    g2, b2 = _gn_params(k3, c)
    w2, bb2 = _conv_params(k4, c, c, 3)
    return dict(g1=g1, b1=b1, w1=w1, bb1=bb1, g2=g2, b2=b2, w2=w2, bb2=bb2)


def _attn_params(key, c):
    kn, kq, kk, kv, kp = jax.random.split(key, 5)
    ng, nb = _gn_params(kn, c)
    qw, qb = _conv_params(kq, c, c, 1)
    kw_, kb_ = _conv_params(kk, c, c, 1)
    vw, vb = _conv_params(kv, c, c, 1)
    pw, pb = _conv_params(kp, c, c, 1)
    return dict(norm_g=ng, norm_b=nb, q_w=qw, q_b=qb, k_w=kw_, k_b=kb_,
                v_w=vw, v_b=vb, proj_w=pw, proj_b=pb)


# ----------------------------------------------------------------------------
# Module wrapper (NCHW in / NCHW out, like the PyTorch nn.Module)
# ----------------------------------------------------------------------------
class LatentRescalerPallas:
    def __init__(self, factor, in_channels, middle_channels, out_channels,
                 depth=2, num_groups=32, *, key):
        assert middle_channels % num_groups == 0
        self.factor = float(factor)
        self.depth = depth
        self.num_groups = num_groups
        ks = jax.random.split(key, 3 + 2 * depth)
        self.conv_in_w, self.conv_in_b = _conv_params(ks[0], middle_channels, in_channels, 3)
        self.res1 = [_resblock_params(ks[1 + i], middle_channels) for i in range(depth)]
        self.attn = _attn_params(ks[1 + depth], middle_channels)
        self.res2 = [_resblock_params(ks[2 + depth + i], middle_channels) for i in range(depth)]
        self.conv_out_w, self.conv_out_b = _conv_params(ks[2 + 2 * depth],
                                                        out_channels, middle_channels, 1)

    def __call__(self, x_nchw):
        g = self.num_groups
        x = jnp.transpose(x_nchw, (0, 2, 3, 1))               # NCHW -> NHWC
        x = conv3x3_gn_swish_pallas(x, self.conv_in_w, self.conv_in_b)
        for p in self.res1:
            x = resnet_block_pallas(x, p, groups=g)
        oh = int(round(x.shape[1] * self.factor))
        ow = int(round(x.shape[2] * self.factor))
        x = interpolate_nearest_pallas(x, oh, ow)
        x = attention_block_pallas(x, self.attn, groups=g)
        for p in self.res2:
            x = resnet_block_pallas(x, p, groups=g)
        x = conv1x1_pallas(x, self.conv_out_w, self.conv_out_b)
        return jnp.transpose(x, (0, 3, 1, 2))                 # NHWC -> NCHW


# ----------------------------------------------------------------------------
# Pure-JAX reference (PyTorch semantics, NCHW) for correctness checking
# ----------------------------------------------------------------------------
def _gn_ref(x, gamma, beta, groups=32, eps=1e-6):
    B, C, H, W = x.shape
    xg = x.reshape(B, groups, (C // groups) * H * W)
    mean = jnp.mean(xg, axis=-1, keepdims=True)
    var = jnp.mean((xg - mean) ** 2, axis=-1, keepdims=True)
    xn = ((xg - mean) / jnp.sqrt(var + eps)).reshape(B, C, H, W)
    return xn * gamma[None, :, None, None] + beta[None, :, None, None]


def _swish_ref(x):
    return x * jax.nn.sigmoid(x)


def _conv3x3_ref(x, w, b):
    y = jax.lax.conv_general_dilated(x, w, window_strides=(1, 1),
                                     padding=((1, 1), (1, 1)),
                                     dimension_numbers=("NCHW", "OIHW", "NCHW"))
    return y + b[None, :, None, None]


def _conv1x1_ref(x, w, b):
    return jnp.einsum("oi,bihw->bohw", w, x) + b[None, :, None, None]


def _resblock_ref(x, p, groups=32):
    h = _conv3x3_ref(_swish_ref(_gn_ref(x, p["g1"], p["b1"], groups)), p["w1"], p["bb1"])
    h = _conv3x3_ref(_swish_ref(_gn_ref(h, p["g2"], p["b2"], groups)), p["w2"], p["bb2"])
    return x + h


def _interp_nearest_ref(x, oh, ow):
    B, C, H, W = x.shape
    rows = (jnp.arange(oh) * H) // oh
    cols = (jnp.arange(ow) * W) // ow
    return x[:, :, rows][:, :, :, cols]


def _attn_ref(x, p, groups=32):
    B, C, H, W = x.shape
    xn = _gn_ref(x, p["norm_g"], p["norm_b"], groups)
    q = _conv1x1_ref(xn, p["q_w"], p["q_b"]).reshape(B, C, H * W)
    k = _conv1x1_ref(xn, p["k_w"], p["k_b"]).reshape(B, C, H * W)
    v = _conv1x1_ref(xn, p["v_w"], p["v_b"]).reshape(B, C, H * W)
    attn = jnp.einsum("bci,bcj->bij", q, k) * (C ** (-0.5))
    attn = jax.nn.softmax(attn, axis=2)
    out = jnp.einsum("bij,bcj->bci", attn, v).reshape(B, C, H, W)
    out = _conv1x1_ref(out, p["proj_w"], p["proj_b"])
    return x + out


def latent_rescaler_reference(x, mod: LatentRescalerPallas):
    g = mod.num_groups
    x = _conv3x3_ref(x, mod.conv_in_w, mod.conv_in_b)
    for p in mod.res1:
        x = _resblock_ref(x, p, g)
    oh = int(round(x.shape[2] * mod.factor))
    ow = int(round(x.shape[3] * mod.factor))
    x = _interp_nearest_ref(x, oh, ow)
    x = _attn_ref(x, mod.attn, g)
    for p in mod.res2:
        x = _resblock_ref(x, p, g)
    x = _conv1x1_ref(x, mod.conv_out_w, mod.conv_out_b)
    return x


if __name__ == "__main__":
    B, Cin, H, W = 2, 4, 16, 16
    Cmid, Cout = 32, 4
    factor = 1.5
    depth = 2

    key = jax.random.PRNGKey(0)
    kx, kp = jax.random.split(key)
    x = jax.random.normal(kx, (B, Cin, H, W), jnp.float32)

    mod = LatentRescalerPallas(factor, Cin, Cmid, Cout, depth=depth, key=kp)
    y = jax.block_until_ready(mod(x))

    oh, ow = int(round(H * factor)), int(round(W * factor))
    assert y.shape == (B, Cout, oh, ow), y.shape
    assert y.dtype == jnp.float32

    y_ref = jax.block_until_ready(latent_rescaler_reference(x, mod))
    err = float(jnp.max(jnp.abs(y - y_ref)))
    # Default (bf16-pass) MXU precision in both kernel and reference -> tolerance
    # sized for bf16 accumulation-order differences across ~10 stacked matmul layers.
    assert jnp.allclose(y, y_ref, atol=5e-2, rtol=5e-2), err

    print("KERNEL_OK")
</pallas_src>

<mosaic_0001>
module attributes {stable_mosaic.version = 11 : i64} {
  func.func @kernel(%arg0: i32, %arg1: memref<1x16x16x4xf32, #tpu.memory_space<vmem>>, %arg2: memref<9x4x32xf32, #tpu.memory_space<vmem>>, %arg3: memref<1x32xf32, #tpu.memory_space<vmem>>, %arg4: memref<1x16x16x32xf32, #tpu.memory_space<vmem>>, %arg5: memref<18x18x4xf32, #tpu.memory_space<vmem>>) attributes {dimension_semantics = [#tpu.dimension_semantics<parallel>], iteration_bounds = array<i64: 2>, scalar_prefetch = 0 : i64, scratch_operands = 1 : i64, tpu.core_type = #tpu.core_type<tc>, window_params = [{transform_indices = @transform_0, window_bounds = array<i64: 1, 16, 16, 4>}, {pipeline_mode = #tpu.pipeline_mode<synchronous>, transform_indices = @transform_1, window_bounds = array<i64: 9, 4, 32>}, {pipeline_mode = #tpu.pipeline_mode<synchronous>, transform_indices = @transform_2, window_bounds = array<i64: 1, 32>}, {transform_indices = @transform_3, window_bounds = array<i64: 1, 16, 16, 32>}]} {
    %c0 = arith.constant 0 : index
    %c0_0 = arith.constant 0 : index
    %c0_1 = arith.constant 0 : index
    %c0_2 = arith.constant 0 : index
    %0 = vector.load %arg1[%c0, %c0_0, %c0_1, %c0_2] : memref<1x16x16x4xf32, #tpu.memory_space<vmem>>, vector<1x16x16x4xf32>
    %1 = vector.shape_cast %0 : vector<1x16x16x4xf32> to vector<16x16x4xf32>
    %cst = arith.constant 0.000000e+00 : f32
    %2 = vector.broadcast %cst : f32 to vector<18x18x4xf32>
    %c0_3 = arith.constant 0 : index
    %c0_4 = arith.constant 0 : index
    %c0_5 = arith.constant 0 : index
    %3 = vector.load %arg5[%c0_3, %c0_4, %c0_5] : memref<18x18x4xf32, #tpu.memory_space<vmem>>, vector<18x18x4xf32>
    tpu.vector_store %arg5[%c0_3, %c0_4, %c0_5], %2 {strides = array<i32>} : memref<18x18x4xf32, #tpu.memory_space<vmem>>, vector<18x18x4xf32>,
    %c1 = arith.constant 1 : index
    %c1_6 = arith.constant 1 : index
    %c0_7 = arith.constant 0 : index
    %4 = vector.load %arg5[%c1, %c1_6, %c0_7] : memref<18x18x4xf32, #tpu.memory_space<vmem>>, vector<16x16x4xf32>
    tpu.vector_store %arg5[%c1, %c1_6, %c0_7], %1 {strides = array<i32>} : memref<18x18x4xf32, #tpu.memory_space<vmem>>, vector<16x16x4xf32>,
    %cst_8 = arith.constant 0.000000e+00 : f32
    %5 = vector.broadcast %cst_8 : f32 to vector<256x32xf32>
    %c0_9 = arith.constant 0 : index
    %c0_10 = arith.constant 0 : index
    %c0_11 = arith.constant 0 : index
    %6 = vector.load %arg5[%c0_9, %c0_10, %c0_11] : memref<18x18x4xf32, #tpu.memory_space<vmem>>, vector<16x16x4xf32>
    %7 = vector.shape_cast %6 : vector<16x16x4xf32> to vector<256x4xf32>
    %c0_12 = arith.constant 0 : index
    %c0_13 = arith.constant 0 : index
    %c0_14 = arith.constant 0 : index
    %8 = vector.load %arg2[%c0_12, %c0_13, %c0_14] : memref<9x4x32xf32, #tpu.memory_space<vmem>>, vector<1x4x32xf32>
    %9 = vector.shape_cast %8 : vector<1x4x32xf32> to vector<4x32xf32>
    %cst_15 = arith.constant dense<0.000000e+00> : vector<256x32xf32>
    %10 = tpu.matmul %7, %9, %cst_15 {dimension_numbers = #tpu.dot_dimension_numbers<[1], [0], [0], [1], [0, 0, 1, 1], [], []>} : vector<256x4xf32>, vector<4x32xf32>, vector<256x32xf32> -> vector<256x32xf32>
    %11 = arith.addf %5, %10 : vector<256x32xf32>
    %c0_16 = arith.constant 0 : index
    %c1_17 = arith.constant 1 : index
    %c0_18 = arith.constant 0 : index
    %12 = vector.load %arg5[%c0_16, %c1_17, %c0_18] : memref<18x18x4xf32, #tpu.memory_space<vmem>>, vector<16x16x4xf32>
    %13 = vector.shape_cast %12 : vector<16x16x4xf32> to vector<256x4xf32>
    %c1_19 = arith.constant 1 : index
    %c0_20 = arith.constant 0 : index
    %c0_21 = arith.constant 0 : index
    %14 = vector.load %arg2[%c1_19, %c0_20, %c0_21] : memref<9x4x32xf32, #tpu.memory_space<vmem>>, vector<1x4x32xf32>
    %15 = vector.shape_cast %14 : vector<1x4x32xf32> to vector<4x32xf32>
    %cst_22 = arith.constant dense<0.000000e+00> : vector<256x32xf32>
    %16 = tpu.matmul %13, %15, %cst_22 {dimension_numbers = #tpu.dot_dimension_numbers<[1], [0], [0], [1], [0, 0, 1, 1], [], []>} : vector<256x4xf32>, vector<4x32xf32>, vector<256x32xf32> -> vector<256x32xf32>
    %17 = arith.addf %11, %16 : vector<256x32xf32>
    %c0_23 = arith.constant 0 : index
    %c2 = arith.constant 2 : index
    %c0_24 = arith.constant 0 : index
    %18 = vector.load %arg5[%c0_23, %c2, %c0_24] : memref<18x18x4xf32, #tpu.memory_space<vmem>>, vector<16x16x4xf32>
    %19 = vector.shape_cast %18 : vector<16x16x4xf32> to vector<256x4xf32>
    %c2_25 = arith.constant 2 : index
    %c0_26 = arith.constant 0 : index
    %c0_27 = arith.constant 0 : index
    %20 = vector.load %arg2[%c2_25, %c0_26, %c0_27] : memref<9x4x32xf32, #tpu.memory_space<vmem>>, vector<1x4x32xf32>
    %21 = vector.shape_cast %20 : vector<1x4x32xf32> to vector<4x32xf32>
    %cst_28 = arith.constant dense<0.000000e+00> : vector<256x32xf32>
    %22 = tpu.matmul %19, %21, %cst_28 {dimension_numbers = #tpu.dot_dimension_numbers<[1], [0], [0], [1], [0, 0, 1, 1], [], []>} : vector<256x4xf32>, vector<4x32xf32>, vector<256x32xf32> -> vector<256x32xf32>
    %23 = arith.addf %17, %22 : vector<256x32xf32>
    %c1_29 = arith.constant 1 : index
    %c0_30 = arith.constant 0 : index
    %c0_31 = arith.constant 0 : index
    %24 = vector.load %arg5[%c1_29, %c0_30, %c0_31] : memref<18x18x4xf32, #tpu.memory_space<vmem>>, vector<16x16x4xf32>
    %25 = vector.shape_cast %24 : vector<16x16x4xf32> to vector<256x4xf32>
    %c3 = arith.constant 3 : index
    %c0_32 = arith.constant 0 : index
    %c0_33 = arith.constant 0 : index
    %26 = vector.load %arg2[%c3, %c0_32, %c0_33] : memref<9x4x32xf32, #tpu.memory_space<vmem>>, vector<1x4x32xf32>
    %27 = vector.shape_cast %26 : vector<1x4x32xf32> to vector<4x32xf32>
    %cst_34 = arith.constant dense<0.000000e+00> : vector<256x32xf32>
    %28 = tpu.matmul %25, %27, %cst_34 {dimension_numbers = #tpu.dot_dimension_numbers<[1], [0], [0], [1], [0, 0, 1, 1], [], []>} : vector<256x4xf32>, vector<4x32xf32>, vector<256x32xf32> -> vector<256x32xf32>
    %29 = arith.addf %23, %28 : vector<256x32xf32>
    %c1_35 = arith.constant 1 : index
    %c1_36 = arith.constant 1 : index
    %c0_37 = arith.constant 0 : index
    %30 = vector.load %arg5[%c1_35, %c1_36, %c0_37] : memref<18x18x4xf32, #tpu.memory_space<vmem>>, vector<16x16x4xf32>
    %31 = vector.shape_cast %30 : vector<16x16x4xf32> to vector<256x4xf32>
    %c4 = arith.constant 4 : index
    %c0_38 = arith.constant 0 : index
    %c0_39 = arith.constant 0 : index
    %32 = vector.load %arg2[%c4, %c0_38, %c0_39] : memref<9x4x32xf32, #tpu.memory_space<vmem>>, vector<1x4x32xf32>
    %33 = vector.shape_cast %32 : vector<1x4x32xf32> to vector<4x32xf32>
    %cst_40 = arith.constant dense<0.000000e+00> : vector<256x32xf32>
    %34 = tpu.matmul %31, %33, %cst_40 {dimension_numbers = #tpu.dot_dimension_numbers<[1], [0], [0], [1], [0, 0, 1, 1], [], []>} : vector<256x4xf32>, vector<4x32xf32>, vector<256x32xf32> -> vector<256x32xf32>
    %35 = arith.addf %29, %34 : vector<256x32xf32>
    %c1_41 = arith.constant 1 : index
    %c2_42 = arith.constant 2 : index
    %c0_43 = arith.constant 0 : index
    %36 = vector.load %arg5[%c1_41, %c2_42, %c0_43] : memref<18x18x4xf32, #tpu.memory_space<vmem>>, vector<16x16x4xf32>
    %37 = vector.shape_cast %36 : vector<16x16x4xf32> to vector<256x4xf32>
    %c5 = arith.constant 5 : index
    %c0_44 = arith.constant 0 : index
    %c0_45 = arith.constant 0 : index
    %38 = vector.load %arg2[%c5, %c0_44, %c0_45] : memref<9x4x32xf32, #tpu.memory_space<vmem>>, vector<1x4x32xf32>
    %39 = vector.shape_cast %38 : vector<1x4x32xf32> to vector<4x32xf32>
    %cst_46 = arith.constant dense<0.000000e+00> : vector<256x32xf32>
    %40 = tpu.matmul %37, %39, %cst_46 {dimension_numbers = #tpu.dot_dimension_numbers<[1], [0], [0], [1], [0, 0, 1, 1], [], []>} : vector<256x4xf32>, vector<4x32xf32>, vector<256x32xf32> -> vector<256x32xf32>
    %41 = arith.addf %35, %40 : vector<256x32xf32>
    %c2_47 = arith.constant 2 : index
    %c0_48 = arith.constant 0 : index
    %c0_49 = arith.constant 0 : index
    %42 = vector.load %arg5[%c2_47, %c0_48, %c0_49] : memref<18x18x4xf32, #tpu.memory_space<vmem>>, vector<16x16x4xf32>
    %43 = vector.shape_cast %42 : vector<16x16x4xf32> to vector<256x4xf32>
    %c6 = arith.constant 6 : index
    %c0_50 = arith.constant 0 : index
    %c0_51 = arith.constant 0 : index
    %44 = vector.load %arg2[%c6, %c0_50, %c0_51] : memref<9x4x32xf32, #tpu.memory_space<vmem>>, vector<1x4x32xf32>
    %45 = vector.shape_cast %44 : vector<1x4x32xf32> to vector<4x32xf32>
    %cst_52 = arith.constant dense<0.000000e+00> : vector<256x32xf32>
    %46 = tpu.matmul %43, %45, %cst_52 {dimension_numbers = #tpu.dot_dimension_numbers<[1], [0], [0], [1], [0, 0, 1, 1], [], []>} : vector<256x4xf32>, vector<4x32xf32>, vector<256x32xf32> -> vector<256x32xf32>
    %47 = arith.addf %41, %46 : vector<256x32xf32>
    %c2_53 = arith.constant 2 : index
    %c1_54 = arith.constant 1 : index
    %c0_55 = arith.constant 0 : index
    %48 = vector.load %arg5[%c2_53, %c1_54, %c0_55] : memref<18x18x4xf32, #tpu.memory_space<vmem>>, vector<16x16x4xf32>
    %49 = vector.shape_cast %48 : vector<16x16x4xf32> to vector<256x4xf32>
    %c7 = arith.constant 7 : index
    %c0_56 = arith.constant 0 : index
    %c0_57 = arith.constant 0 : index
    %50 = vector.load %arg2[%c7, %c0_56, %c0_57] : memref<9x4x32xf32, #tpu.memory_space<vmem>>, vector<1x4x32xf32>
    %51 = vector.shape_cast %50 : vector<1x4x32xf32> to vector<4x32xf32>
    %cst_58 = arith.constant dense<0.000000e+00> : vector<256x32xf32>
    %52 = tpu.matmul %49, %51, %cst_58 {dimension_numbers = #tpu.dot_dimension_numbers<[1], [0], [0], [1], [0, 0, 1, 1], [], []>} : vector<256x4xf32>, vector<4x32xf32>, vector<256x32xf32> -> vector<256x32xf32>
    %53 = arith.addf %47, %52 : vector<256x32xf32>
    %c2_59 = arith.constant 2 : index
    %c2_60 = arith.constant 2 : index
    %c0_61 = arith.constant 0 : index
    %54 = vector.load %arg5[%c2_59, %c2_60, %c0_61] : memref<18x18x4xf32, #tpu.memory_space<vmem>>, vector<16x16x4xf32>
    %55 = vector.shape_cast %54 : vector<16x16x4xf32> to vector<256x4xf32>
    %c8 = arith.constant 8 : index
    %c0_62 = arith.constant 0 : index
    %c0_63 = arith.constant 0 : index
    %56 = vector.load %arg2[%c8, %c0_62, %c0_63] : memref<9x4x32xf32, #tpu.memory_space<vmem>>, vector<1x4x32xf32>
    %57 = vector.shape_cast %56 : vector<1x4x32xf32> to vector<4x32xf32>
    %cst_64 = arith.constant dense<0.000000e+00> : vector<256x32xf32>
    %58 = tpu.matmul %55, %57, %cst_64 {dimension_numbers = #tpu.dot_dimension_numbers<[1], [0], [0], [1], [0, 0, 1, 1], [], []>} : vector<256x4xf32>, vector<4x32xf32>, vector<256x32xf32> -> vector<256x32xf32>
    %59 = arith.addf %53, %58 : vector<256x32xf32>
    %c0_65 = arith.constant 0 : index
    %c0_66 = arith.constant 0 : index
    %60 = vector.load %arg3[%c0_65, %c0_66] : memref<1x32xf32, #tpu.memory_space<vmem>>, vector<1x32xf32>
    %61 = vector.broadcast %60 : vector<1x32xf32> to vector<256x32xf32>
    %62 = arith.addf %59, %61 : vector<256x32xf32>
    %63 = vector.shape_cast %62 : vector<256x32xf32> to vector<16x16x32xf32>
    %c0_67 = arith.constant 0 : index
    %c0_68 = arith.constant 0 : index
    %c0_69 = arith.constant 0 : index
    %c0_70 = arith.constant 0 : index
    %64 = vector.load %arg4[%c0_67, %c0_68, %c0_69, %c0_70] : memref<1x16x16x32xf32, #tpu.memory_space<vmem>>, vector<1x16x16x32xf32>
    %65 = vector.shape_cast %64 : vector<1x16x16x32xf32> to vector<16x16x32xf32>
    %66 = vector.shape_cast %63 : vector<16x16x32xf32> to vector<1x16x16x32xf32>
    tpu.vector_store %arg4[%c0_67, %c0_68, %c0_69, %c0_70], %66 {strides = array<i32>} : memref<1x16x16x32xf32, #tpu.memory_space<vmem>>, vector<1x16x16x32xf32>,
    return
  }
  func.func @transform_0(%arg0: i32) -> (i32, i32, i32, i32) {
    %c0_i32 = arith.constant 0 : i32
    %c0_i32_0 = arith.constant 0 : i32
    %c0_i32_1 = arith.constant 0 : i32
    %c0_i32_2 = arith.constant 0 : i32
    return %arg0, %c0_i32, %c0_i32_0, %c0_i32_1 : i32, i32, i32, i32
  }
  func.func @transform_1(%arg0: i32) -> (i32, i32, i32) {
    %c0_i32 = arith.constant 0 : i32
    %c0_i32_0 = arith.constant 0 : i32
    %c0_i32_1 = arith.constant 0 : i32
    %c0_i32_2 = arith.constant 0 : i32
    return %c0_i32, %c0_i32_0, %c0_i32_1 : i32, i32, i32
  }
  func.func @transform_2(%arg0: i32) -> (i32, i32) {
    %c0_i32 = arith.constant 0 : i32
    %c0_i32_0 = arith.constant 0 : i32
    %c0_i32_1 = arith.constant 0 : i32
    return %c0_i32, %c0_i32_0 : i32, i32
  }
  func.func @transform_3(%arg0: i32) -> (i32, i32, i32, i32) {
    %c0_i32 = arith.constant 0 : i32
    %c0_i32_0 = arith.constant 0 : i32
    %c0_i32_1 = arith.constant 0 : i32
    %c0_i32_2 = arith.constant 0 : i32
    return %arg0, %c0_i32, %c0_i32_0, %c0_i32_1 : i32, i32, i32, i32
  }
}

</mosaic_0001>

<bundles_post_ra>
// kernel: tpu_custom_call.1
= control target key start
LH: loop header
LB: loop body
LE: loop exit
PB: predicated region body
PF: predicated region fallthrough
CT: control target
= control target key end

     0   :  { %8 = vsyncpa [#allocation4], 0  ;;  %s4642_s0 = inlined_call_operand.vmem [shape: f32[2,16,16,4], index: 0, kind: input, shape index: {}]   ;;  %s4643_s1 = inlined_call_operand.vmem [shape: f32[9,4,32], index: 1, kind: input, shape index: {}]   ;;  %s4644_s2 = inlined_call_operand.vmem [shape: f32[1,32], index: 2, kind: input, shape index: {}]   ;;  %s4645_s3 = inlined_call_operand.hbm [shape: f32[2,16,16,32], index: 3, kind: output, shape index: {}]  }
   0x1   :  { %10 = vsyncpa [#allocation4 + $0x1], 0  ;;  %s3328_s12 = smov 0   ;;  %s3330_s13 = smov 0  }
   0x2   :  { %s3332_s14 = smov 0   ;;  %s3334_s15 = smov 0  }
   0x3 LB: > { %s3349_s16 = sadd.s32 4294967295, %s3303_s15   ;;  %s2876_s17 = sadd.s32 4294967294, %s3303_s15   ;;  %s3303_s15 = sphi %s3334_s15, %s4771_s15   ;;  %s3299_s14 = sphi %s3332_s14, %s4770_s14   ;;  %s3295_s13 = sphi %s3330_s13, %s4769_s13   ;;  %s3291_s12 = sphi %s3328_s12, %s4768_s12  }
   0x4   : > { %s3353_s18 = sadd.s32 1, %s3303_s15   ;;  %s91_s19 = sadd.s32 1, %s3299_s14 }
   0x5   : > { %s88_s20 = ssub.s32 %s3303_s15, %s3353_s18  ;;  %p101_p0 = scmp.ne.s32.totalorder %s3299_s14, %s3295_s13 }
   0x6   : > { %p89_p1 = scmp.eq.s32.totalorder %s88_s20, 0  ;;  %p102_p2 = scmp.eq.s32.totalorder %s3349_s16, 1 }
   0x7   : > { %p107_p3 = scmp.ne.s32.totalorder %s3295_s13, %s3291_s12  ;;  %p108_p4 = scmp.eq.s32.totalorder %s2876_s17, 1 }
   0x8   : > { %s3364_s21 = scalar_select %p89_p1, %s3299_s14, %s91_s19  }
   0x9   : > { %p3366_p5 = por %p102_p2, %p101_p0  ;;  %p3370_p6 = por %p108_p4, %p107_p3 }
   0xa   : > { %p2879_p7 = scmp.ge.s32.totalorder %s3303_s15, 1  ;;  %p140_p8 = scmp.lt.s32.totalorder %s3303_s15, 3 }
   0xc   : > { %p141_p9 = pnand %p2879_p7, %p140_p8 }
   0xe   : > { %144 = sbr.rel (%p141_p9) target bundleno = 790 (0x316), region = 32 }
  0x13   : > { %v2883_v0 = vld [vmem:[%s4643_s1 + $0x4] sm:$0xf]  ;;  %vm453_vm0 = vcmask 1043456   ;;  %p164_p10 = scmp.lt.s32.totalorder %s3349_s16, 1  ;;  %vm201_vm1 = vcmask 31744   ;;  %v3305_v1 = vmov 0.0  }
  0x14   : > { %3195 = vmatpush.msk.msra.mxu1 %vm453_vm0, %v2883_v0  ;;  %3196 = vmatpush.msk.msra.mxu2 %vm453_vm0, %v2883_v0  ;;  %215 = vst.msk [vmem:[#allocation2 + $0x60] sm:$0xff] %vm201_vm1, %v3305_v1  ;;  %v2950_v4 = vld [vmem:[%s4643_s1 + $0x8] sm:$0xf]  ;;  %v2984_v5 = vld [vmem:[%s4643_s1 + $0xc] sm:$0xf]  ;;  %vm204_vm2 = vcmask 25600  }
  0x15   : > { %s165_s26 = scalar_select %p164_p10, %s3349_s16, 1  ;;  %216 = vst.msk [vmem:[#allocation2 + $0x68] sm:$0xff] %vm201_vm1, %v3305_v1  ;;  %3197 = vmatpush.msk.msra.mxu3 %vm453_vm0, %v2883_v0  ;;  %2884 = vmatpush.msk.msra.mxu0 %vm453_vm0, %v2883_v0  ;;  %v322_v6 = vld [vmem:[%s4643_s1] sm:$0xf]  ;;  %v3018_v10 = vld [vmem:[%s4643_s1 + $0x10] sm:$0xf] }
  0x16   : > { %202 = vst.msk [vmem:[#allocation2] sm:$0xff] %vm201_vm1, %v3305_v1  ;;  %2951 = vmatpush.msk.msrb.mxu2 %vm453_vm0, %v2950_v4  ;;  %2917 = vmatpush.msk.msrb.mxu1 %vm453_vm0, %v322_v6  ;;  %v3086_v57 = vld [vmem:[%s4643_s1 + $0x18] sm:$0xf]  ;;  %v3120_v58 = vld [vmem:[%s4643_s1 + $0x1c] sm:$0xf]  ;;  %s161_s29 = sand.u32 1, %s3295_s13  }
  0x17   : > { %s3193_s27 = sshll.u32 %s165_s26, 8  ;;  %203 = vst.msk [vmem:[#allocation2 + $0x8] sm:$0xff] %vm201_vm1, %v3305_v1  ;;  %2985 = vmatpush.msk.msrb.mxu3 %vm453_vm0, %v2984_v5  ;;  %3019 = vmatpush.msk.msrb.mxu0 %vm453_vm0, %v3018_v10  ;;  %v3052_v59 = vld [vmem:[%s4643_s1 + $0x14] sm:$0xf]  ;;  %v3154_v0 = vld [vmem:[%s4643_s1 + $0x20] sm:$0xf] }
  0x18   : > { %s3396_s30 = scalar_lea.vmem %s4642_s0, %s3193_s27  ;;  %206 = vst.msk [vmem:[#allocation2 + $0x18] sm:$0xff] %vm201_vm1, %v3305_v1  ;;  %vm2765_vm3 = vcmask 261120   ;;  %s3194_s7 = sshll.u32 %s3349_s16, 8 }
  0x19   : > { %v175_v2 = vld [vmem:[%s3396_s30 + $0x30] sm:$0xff]  ;;  %207 = vst.msk [vmem:[#allocation2 + $0x20] sm:$0xff] %vm201_vm1, %v3305_v1  ;;  %v176_v11 = vld [vmem:[%s3396_s30 + $0x38] sm:$0xff]  ;;  %v177_v18 = vld [vmem:[%s3396_s30 + $0x40] sm:$0xff]  ;;  %s2810_s10 = scalar_lea.hbm %s4645_s3, %s3194_s7  ;;  %s2799_s17 = scalar_lea.sflag [#allocation4], %s161_s29 }
  0x1a   : > { %264 = vst.msk [vmem:[#allocation2 + $0x61] sm:$0xff] %vm201_vm1, %v175_v2  ;;  %v183_v7 = vld [vmem:[%s3396_s30 + $0x70] sm:$0xff]  ;;  %v184_v16 = vld [vmem:[%s3396_s30 + $0x78] sm:$0xff]  ;;  %v185_v19 = vld [vmem:[%s3396_s30 + $0x80] sm:$0xff]  ;;  %s2813_s16 = sshll.u32 %s2810_s10, 4  ;;  %s3261_s26 = scalar_lea.hbm %s4645_s3, 512  ;;  %s2814_s16 = int_to_ptr.hbm [resolvable:$true] %s2813_s16 }
  0x1b   : > { %209 = vst.msk [vmem:[#allocation2 + $0x30] sm:$0xff] %vm201_vm1, %v3305_v1  ;;  %v191_v9 = vld [vmem:[%s3396_s30 + $0xb0] sm:$0xff]  ;;  %v192_v17 = vld [vmem:[%s3396_s30 + $0xb8] sm:$0xff]  ;;  %v193_v20 = vld [vmem:[%s3396_s30 + $0xc0] sm:$0xff]  ;;  %s3255_s19 = sshra.s32 %s2814_s16, 4  ;;  %s3256_s19 = int_to_ptr.hbm [resolvable:$true] %s3255_s19 }
  0x1c   : > { %210 = vst.msk [vmem:[#allocation2 + $0x38] sm:$0xff] %vm201_vm1, %v3305_v1  ;;  %v178_v21 = vld [vmem:[%s3396_s30 + $0x48] sm:$0xff]  ;;  %v169_v23 = vld [vmem:[%s3396_s30] sm:$0xff]  ;;  %v179_v25 = vld [vmem:[%s3396_s30 + $0x50] sm:$0xff]  ;;  %s3257_s20 = scalar_lea.hbm %s3256_s19, 256  ;;  %p3262_p0 = scmp.lt.s32.totalorder %s3256_s19, %s4645_s3 }
  0x1d   : > { %212 = vst.msk [vmem:[#allocation2 + $0x48] sm:$0xff] %vm201_vm1, %v3305_v1  ;;  %v186_v22 = vld [vmem:[%s3396_s30 + $0x88] sm:$0xff]  ;;  %v187_v27 = vld [vmem:[%s3396_s30 + $0x90] sm:$0xff]  ;;  %v180_v32 = vld [vmem:[%s3396_s30 + $0x58] sm:$0xff]  ;;  %p3258_p11 = scmp.ne.s32.totalorder %s3256_s19, %s3257_s20  ;;  %p3263_p1 = scmp.lt.s32.totalorder %s3261_s26, %s3257_s20 }
  0x1e   : > { %213 = vst.msk [vmem:[#allocation2 + $0x50] sm:$0xff] %vm201_vm1, %v3305_v1  ;;  %v323_v8 = vld [vmem:[#allocation2 + $0x1] sm:$0xff]  ;;  %v195_v31 = vld [vmem:[%s3396_s30 + $0xd0] sm:$0xff]  ;;  %v188_v33 = vld [vmem:[%s3396_s30 + $0x98] sm:$0xff] }
  0x1f   : > { %218 = vst.msk [vmem:[#allocation2 + $0x78] sm:$0xff] %vm201_vm1, %v3305_v1  ;;  %2885 = vmatmul.msk.f32.vlgmr.msra.gmra.mxu0 %vm201_vm1, %v323_v8  ;;  %v194_v24 = vld [vmem:[%s3396_s30 + $0xc8] sm:$0xff]  ;;  %v171_v34 = vld [vmem:[%s3396_s30 + $0x10] sm:$0xff]  ;;  %v196_v36 = vld [vmem:[%s3396_s30 + $0xd8] sm:$0xff]  ;;  %p3259_p12 = pnand %p3258_p11, %p3366_p5  ;;  %p3264_p2 = por %p3263_p1, %p3262_p0 }
  0x20   : > { %219 = vst.msk [vmem:[#allocation2 + $0x80] sm:$0xff] %vm201_vm1, %v3305_v1  ;;  %v170_v29 = vld [vmem:[%s3396_s30 + $0x8] sm:$0xff]  ;;  %v181_v39 = vld [vmem:[%s3396_s30 + $0x60] sm:$0xff]  ;;  %v172_v42 = vld [vmem:[%s3396_s30 + $0x18] sm:$0xff]  ;;  %3155 = vmatpush.msk.msra.mxu0 %vm453_vm0, %v3154_v0 }
  0x21   : > { %v3416_v3 = vld [vmem:[#allocation2 + $0x61] sm:$0xff]  ;;  %221 = vst.msk [vmem:[#allocation2 + $0x90] sm:$0xff] %vm201_vm1, %v3305_v1  ;;  %p3260_p13 = pneg %p3259_p12 }
  0x22   : > { %2893 = vmatmul.msk.f32.vlgmr.msra.gmra.mxu1 %vm201_vm1, %v3416_v3  ;;  %222 = vst.msk [vmem:[#allocation2 + $0x98] sm:$0xff] %vm201_vm1, %v3305_v1  ;;  %v189_v41 = vld [vmem:[%s3396_s30 + $0xa0] sm:$0xff]  ;;  %v182_v44 = vld [vmem:[%s3396_s30 + $0x68] sm:$0xff] }
  0x23   : > { %224 = vst.msk [vmem:[#allocation2 + $0xa8] sm:$0xff] %vm201_vm1, %v3305_v1  ;;  %v197_v43 = vld [vmem:[%s3396_s30 + $0xe0] sm:$0xff]  ;;  %v190_v45 = vld [vmem:[%s3396_s30 + $0xa8] sm:$0xff]  ;;  %3053 = vmatpush.msk.msra.mxu1 %vm453_vm0, %v3052_v59  ;;  %p3265_p3 = pnand %p3264_p2, %p3260_p13 }
  0x24   : > { %225 = vst.msk [vmem:[#allocation2 + $0xb0] sm:$0xff] %vm201_vm1, %v3305_v1  ;;  %v173_v47 = vld [vmem:[%s3396_s30 + $0x20] sm:$0xff]  ;;  %v198_v49 = vld [vmem:[%s3396_s30 + $0xe8] sm:$0xff] }
  0x25   : > { %227 = vst.msk [vmem:[#allocation2 + $0xc0] sm:$0xff] %vm201_vm1, %v3305_v1  ;;  %v174_v52 = vld [vmem:[%s3396_s30 + $0x28] sm:$0xff] }
  0x26   : > { %228 = vst.msk [vmem:[#allocation2 + $0xc8] sm:$0xff] %vm201_vm1, %v3305_v1  ;;  %v782_v10 = vld [vmem:[#allocation2 + $0x2] sm:$0xff] }
  0x27   : > { %230 = vst.msk [vmem:[#allocation2 + $0xd8] sm:$0xff] %vm201_vm1, %v3305_v1 }
  0x28   : > { %231 = vst.msk [vmem:[#allocation2 + $0xe0] sm:$0xff] %vm201_vm1, %v3305_v1 }
  0x29   : > { %233 = vst.msk [vmem:[#allocation2 + $0xf0] sm:$0xff] %vm201_vm1, %v3305_v1 }
  0x2a   : > { %234 = vst.msk [vmem:[#allocation2 + $0xf8] sm:$0xff] %vm201_vm1, %v3305_v1 }
  0x2b   : > { %236 = vst.msk [vmem:[#allocation2 + $0x108] sm:$0xff] %vm201_vm1, %v3305_v1 }
  0x2c   : > { %237 = vst.msk [vmem:[#allocation2 + $0x110] sm:$0xff] %vm201_vm1, %v3305_v1 }
  0x2d   : > { %239 = vst.msk [vmem:[#allocation2 + $0x120] sm:$0xff] %vm201_vm1, %v3305_v1 }
  0x2e   : > { %240 = vst.msk [vmem:[#allocation2 + $0x128] sm:$0xff] %vm201_vm1, %v3305_v1 }
  0x2f   : > { %242 = vst.msk [vmem:[#allocation2 + $0x138] sm:$0xff] %vm201_vm1, %v3305_v1 }
  0x30   : > { %243 = vst.msk [vmem:[#allocation2 + $0x140] sm:$0xff] %vm201_vm1, %v3305_v1 }
  0x31   : > { %245 = vst.msk [vmem:[#allocation2 + $0x150] sm:$0xff] %vm201_vm1, %v3305_v1 }
  0x32   : > { %246 = vst.msk [vmem:[#allocation2 + $0x158] sm:$0xff] %vm201_vm1, %v3305_v1 }
  0x33   : > { %248 = vst.msk [vmem:[#allocation2 + $0x168] sm:$0xff] %vm201_vm1, %v3305_v1 }
  0x34   : > { %249 = vst.msk [vmem:[#allocation2 + $0x170] sm:$0xff] %vm201_vm1, %v3305_v1 }
  0x35   : > { %251 = vst.msk [vmem:[#allocation2 + $0x180] sm:$0xff] %vm201_vm1, %v3305_v1 }
  0x36   : > { %252 = vst.msk [vmem:[#allocation2 + $0x188] sm:$0xff] %vm201_vm1, %v3305_v1 }
  0x37   : > { %254 = vst.msk [vmem:[#allocation2 + $0x198] sm:$0xff] %vm201_vm1, %v3305_v1 }
  0x38   : > { %255 = vst.msk [vmem:[#allocation2 + $0x1a0] sm:$0xff] %vm201_vm1, %v3305_v1 }
  0x39   : > { %272 = vst.msk [vmem:[#allocation2 + $0xc1] sm:$0xff] %vm201_vm1, %v183_v7 }
  0x3a   : > { %280 = vst.msk [vmem:[#allocation2 + $0x121] sm:$0xff] %vm201_vm1, %v191_v9  ;;  %v290_v9 = vld [vmem:[#allocation2] sm:$0xff] }
  0x3b   : > { %217 = vst.msk [vmem:[#allocation2 + $0x70] sm:$0x3] %vm204_vm2, %v3305_v1 }
  0x3c   : > { %265 = vst.msk [vmem:[#allocation2 + $0x69] sm:$0xff] %vm201_vm1, %v176_v11 }
  0x3d   : > { %205 = vst.msk [vmem:[#allocation2 + $0x10] sm:$0x3] %vm204_vm2, %v3305_v1 }
  0x3e   : > { %208 = vst.msk [vmem:[#allocation2 + $0x28] sm:$0x3] %vm204_vm2, %v3305_v1 }
  0x3f   : > { %211 = vst.msk [vmem:[#allocation2 + $0x40] sm:$0x3] %vm204_vm2, %v3305_v1 }
  0x40   : > { %v3499_v12 = vld [vmem:[#allocation2 + $0xc1] sm:$0xff]  ;;  %214 = vst.msk [vmem:[#allocation2 + $0x58] sm:$0x3] %vm204_vm2, %v3305_v1 }
  0x41   : > { %2901 = vmatmul.msk.f32.vlgmr.msra.gmra.mxu2 %vm201_vm1, %v3499_v12  ;;  %v3505_v13 = vld [vmem:[#allocation2 + $0x121] sm:$0xff]  ;;  %220 = vst.msk [vmem:[#allocation2 + $0x88] sm:$0x3] %vm204_vm2, %v3305_v1 }
  0x42   : > { %2909 = vmatmul.msk.f32.vlgmr.msra.gmra.mxu3 %vm201_vm1, %v3505_v13  ;;  %223 = vst.msk [vmem:[#allocation2 + $0xa0] sm:$0x3] %vm204_vm2, %v3305_v1  ;;  %3087 = vmatpush.msk.msra.mxu2 %vm453_vm0, %v3086_v57 }
  0x43   : > { %v3513_v14 = vld [vmem:[#allocation2 + $0x69] sm:$0xff]  ;;  %226 = vst.msk [vmem:[#allocation2 + $0xb8] sm:$0x3] %vm204_vm2, %v3305_v1  ;;  %3121 = vmatpush.msk.msra.mxu3 %vm453_vm0, %v3120_v58 }
  0x44   : > { %2894 = vmatmul.msk.f32.gmra.mxu1 %vm201_vm1, %v3513_v14  ;;  %229 = vst.msk [vmem:[#allocation2 + $0xd0] sm:$0x3] %vm204_vm2, %v3305_v1  ;;  %v324_v15 = vld [vmem:[#allocation2 + $0x9] sm:$0xff] }
  0x45   : > { %232 = vst.msk [vmem:[#allocation2 + $0xe8] sm:$0x3] %vm204_vm2, %v3305_v1  ;;  %2886 = vmatmul.msk.f32.gmra.mxu0 %vm201_vm1, %v324_v15  ;;  %v291_v15 = vld [vmem:[#allocation2 + $0x8] sm:$0xff] }
  0x46   : > { %235 = vst.msk [vmem:[#allocation2 + $0x100] sm:$0x3] %vm204_vm2, %v3305_v1 }
  0x47   : > { %238 = vst.msk [vmem:[#allocation2 + $0x118] sm:$0x3] %vm204_vm2, %v3305_v1 }
  0x48   : > { %241 = vst.msk [vmem:[#allocation2 + $0x130] sm:$0x3] %vm204_vm2, %v3305_v1 }
  0x49   : > { %244 = vst.msk [vmem:[#allocation2 + $0x148] sm:$0x3] %vm204_vm2, %v3305_v1 }
  0x4a   : > { %247 = vst.msk [vmem:[#allocation2 + $0x160] sm:$0x3] %vm204_vm2, %v3305_v1 }
  0x4b   : > { %250 = vst.msk [vmem:[#allocation2 + $0x178] sm:$0x3] %vm204_vm2, %v3305_v1 }
  0x4c   : > { %253 = vst.msk [vmem:[#allocation2 + $0x190] sm:$0x3] %vm204_vm2, %v3305_v1 }
  0x4d   : > { %256 = vst.msk [vmem:[#allocation2 + $0x1a8] sm:$0x3] %vm204_vm2, %v3305_v1 }
  0x4e   : > { %273 = vst.msk [vmem:[#allocation2 + $0xc9] sm:$0xff] %vm201_vm1, %v184_v16  ;;  %v783_v16 = vld [vmem:[#allocation2 + $0xa] sm:$0xff] }
  0x4f   : > { %281 = vst.msk [vmem:[#allocation2 + $0x129] sm:$0xff] %vm201_vm1, %v192_v17 }
  0x50   : > { %266 = vst.msk [vmem:[#allocation2 + $0x79] sm:$0xff] %vm201_vm1, %v177_v18 }
  0x51   : > { %274 = vst.msk [vmem:[#allocation2 + $0xd9] sm:$0xff] %vm201_vm1, %v185_v19 }
  0x52   : > { %282 = vst.msk [vmem:[#allocation2 + $0x139] sm:$0xff] %vm201_vm1, %v193_v20 }
  0x53   : > { %267 = vst.msk [vmem:[#allocation2 + $0x81] sm:$0xff] %vm201_vm1, %v178_v21 }
  0x54   : > { %275 = vst.msk [vmem:[#allocation2 + $0xe1] sm:$0xff] %vm201_vm1, %v186_v22 }
  0x55   : > { %v3557_v26 = vld [vmem:[#allocation2 + $0xc9] sm:$0xff]  ;;  %258 = vst.msk [vmem:[#allocation2 + $0x19] sm:$0xff] %vm201_vm1, %v169_v23 }
  0x56   : > { %2902 = vmatmul.msk.f32.gmra.mxu2 %vm201_vm1, %v3557_v26  ;;  %v3563_v28 = vld [vmem:[#allocation2 + $0x129] sm:$0xff]  ;;  %283 = vst.msk [vmem:[#allocation2 + $0x141] sm:$0xff] %vm201_vm1, %v194_v24 }
  0x57   : > { %2910 = vmatmul.msk.f32.gmra.mxu3 %vm201_vm1, %v3563_v28  ;;  %v3569_v30 = vld [vmem:[#allocation2 + $0x79] sm:$0xff]  ;;  %268 = vst.msk [vmem:[#allocation2 + $0x91] sm:$0xff] %vm201_vm1, %v179_v25 }
  0x58   : > { %2895 = vmatmul.msk.f32.gmra.mxu1 %vm201_vm1, %v3569_v30  ;;  %276 = vst.msk [vmem:[#allocation2 + $0xf1] sm:$0xff] %vm201_vm1, %v187_v27  ;;  %v3581_v35 = vld [vmem:[#allocation2 + $0xd9] sm:$0xff] }
  0x59   : > { %259 = vst.msk [vmem:[#allocation2 + $0x21] sm:$0xff] %vm201_vm1, %v170_v29  ;;  %v3585_v37 = vld [vmem:[#allocation2 + $0x139] sm:$0xff] }
  0x5a   : > { %284 = vst.msk [vmem:[#allocation2 + $0x151] sm:$0xff] %vm201_vm1, %v195_v31  ;;  %v3591_v40 = vld [vmem:[#allocation2 + $0x81] sm:$0xff] }
  0x5b   : > { %269 = vst.msk [vmem:[#allocation2 + $0x99] sm:$0xff] %vm201_vm1, %v180_v32  ;;  %v3615_v48 = vld [vmem:[#allocation2 + $0xe1] sm:$0xff] }
  0x5c   : > { %v3587_v38 = vld [vmem:[#allocation2 + $0x19] sm:$0xff]  ;;  %277 = vst.msk [vmem:[#allocation2 + $0xf9] sm:$0xff] %vm201_vm1, %v188_v33  ;;  %v3786_v33 = vld [vmem:[#allocation2 + $0x68] sm:$0xff] }
  0x5d   : > { %2887 = vmatmul.msk.f32.gmra.mxu0 %vm201_vm1, %v3587_v38  ;;  %260 = vst.msk [vmem:[#allocation2 + $0x31] sm:$0xff] %vm201_vm1, %v171_v34  ;;  %v3619_v50 = vld [vmem:[#allocation2 + $0x141] sm:$0xff]  ;;  %v1060_v11 = vld [vmem:[#allocation2 + $0x18] sm:$0xff] }
  0x5e   : > { %2903 = vmatmul.msk.f32.gmra.mxu2 %vm201_vm1, %v3581_v35  ;;  %285 = vst.msk [vmem:[#allocation2 + $0x159] sm:$0xff] %vm201_vm1, %v196_v36  ;;  %v3622_v51 = vld [vmem:[#allocation2 + $0x91] sm:$0xff]  ;;  %v3772_v29 = vld [vmem:[#allocation2 + $0x60] sm:$0xff] }
  0x5f   : > { %2911 = vmatmul.msk.f32.gmra.mxu3 %vm201_vm1, %v3585_v37  ;;  %270 = vst.msk [vmem:[#allocation2 + $0xa9] sm:$0xff] %vm201_vm1, %v181_v39  ;;  %v3638_v54 = vld [vmem:[#allocation2 + $0xf1] sm:$0xff]  ;;  %v3798_v34 = vld [vmem:[#allocation2 + $0x62] sm:$0xff] }
  0x60   : > { %2896 = vmatmul.msk.f32.gmra.mxu1 %vm201_vm1, %v3591_v40  ;;  %278 = vst.msk [vmem:[#allocation2 + $0x109] sm:$0xff] %vm201_vm1, %v189_v41  ;;  %v3611_v46 = vld [vmem:[#allocation2 + $0x21] sm:$0xff] }
  0x61   : > { %261 = vst.msk [vmem:[#allocation2 + $0x39] sm:$0xff] %vm201_vm1, %v172_v42  ;;  %v3640_v55 = vld [vmem:[#allocation2 + $0x151] sm:$0xff]  ;;  %v1061_v17 = vld [vmem:[#allocation2 + $0x20] sm:$0xff] }
  0x62   : > { %286 = vst.msk [vmem:[#allocation2 + $0x169] sm:$0xff] %vm201_vm1, %v197_v43  ;;  %v3642_v56 = vld [vmem:[#allocation2 + $0x99] sm:$0xff]  ;;  %v3734_v20 = vld [vmem:[#allocation2 + $0x22] sm:$0xff]  ;;  %v3818_v42 = vld [vmem:[#allocation2 + $0x6a] sm:$0xff] }
  0x63   : > { %271 = vst.msk [vmem:[#allocation2 + $0xb1] sm:$0xff] %vm201_vm1, %v182_v44  ;;  %v3666_v61 = vld [vmem:[#allocation2 + $0xf9] sm:$0xff]  ;;  %v3858_v59 = vld [vmem:[#allocation2 + $0x82] sm:$0xff] }
  0x64   : > { %279 = vst.msk [vmem:[#allocation2 + $0x111] sm:$0xff] %vm201_vm1, %v190_v45  ;;  %v3636_v53 = vld [vmem:[#allocation2 + $0x31] sm:$0xff]  ;;  %v3723_v18 = vld [vmem:[#allocation2 + $0x1a] sm:$0xff] }
  0x65   : > { %2888 = vmatmul.msk.f32.gmra.mxu0 %vm201_vm1, %v3611_v46  ;;  %262 = vst.msk [vmem:[#allocation2 + $0x49] sm:$0xff] %vm201_vm1, %v173_v47  ;;  %v3668_v62 = vld [vmem:[#allocation2 + $0x159] sm:$0xff]  ;;  %v3725_v19 = vld [vmem:[#allocation2 + $0x30] sm:$0xff] }
  0x66   : > { %2904 = vmatmul.msk.f32.gmra.mxu2 %vm201_vm1, %v3615_v48  ;;  %287 = vst.msk [vmem:[#allocation2 + $0x171] sm:$0xff] %vm201_vm1, %v198_v49  ;;  %v3670_v63 = vld [vmem:[#allocation2 + $0xa9] sm:$0xff]  ;;  %v3820_v43 = vld [vmem:[#allocation2 + $0x80] sm:$0xff]  ;;  %v3860_v0 = vld [vmem:[#allocation2 + $0x98] sm:$0xff] }
  0x67   : > { %2912 = vmatmul.msk.f32.gmra.mxu3 %vm201_vm1, %v3619_v50  ;;  %263 = vst.msk [vmem:[#allocation2 + $0x51] sm:$0xff] %vm201_vm1, %v174_v52  ;;  %v3686_v2 = vld [vmem:[#allocation2 + $0x109] sm:$0xff]  ;;  %v3838_v47 = vld [vmem:[#allocation2 + $0x7a] sm:$0xff] }
  0x68   : > { %2897 = vmatmul.msk.f32.gmra.mxu1 %vm201_vm1, %v3622_v51  ;;  %v3664_v60 = vld [vmem:[#allocation2 + $0x39] sm:$0xff]  ;;  %4676 = vst [vmem:[#allocation6_spill] sm:$0xff] %v3786_v33  ;;  %v3840_v49 = vld [vmem:[#allocation2 + $0x90] sm:$0xff] }
  0x69   : > { %v3688_v4 = vld [vmem:[#allocation2 + $0x169] sm:$0xff]  ;;  %v3736_v21 = vld [vmem:[#allocation2 + $0x38] sm:$0xff]  ;;  %4679 = vst [vmem:[#allocation9_spill] sm:$0xff] %v3818_v42 }
  0x6a   : > { %v3690_v5 = vld [vmem:[#allocation2 + $0xb1] sm:$0xff]  ;;  %v3758_v24 = vld [vmem:[#allocation2 + $0x3a] sm:$0xff]  ;;  %4680 = vst [vmem:[#allocation10_spill] sm:$0xff] %v3820_v43 }
  0x6b   : > { %v3702_v7 = vld [vmem:[#allocation2 + $0x111] sm:$0xff]  ;;  %4682 = vst [vmem:[#allocation12_spill] sm:$0xff] %v3838_v47 }
  0x6c   : > { %v3684_v1 = vld [vmem:[#allocation2 + $0x49] sm:$0xff]  ;;  %v3746_v22 = vld [vmem:[#allocation2 + $0x32] sm:$0xff]  ;;  %4683 = vst [vmem:[#allocation13_spill] sm:$0xff] %v3840_v49 }
  0x6d   : > { %2889 = vmatmul.msk.f32.gmra.mxu0 %vm201_vm1, %v3636_v53  ;;  %v3704_v8 = vld [vmem:[#allocation2 + $0x171] sm:$0xff]  ;;  %v3748_v23 = vld [vmem:[#allocation2 + $0x48] sm:$0xff]  ;;  %4685 = vst [vmem:[#allocation15_spill] sm:$0xff] %v3858_v59 }
  0x6e   : > { %2905 = vmatmul.msk.f32.gmra.mxu2 %vm201_vm1, %v3638_v54  ;;  %v3700_v6 = vld [vmem:[#allocation2 + $0x51] sm:$0xff]  ;;  %4686 = vst [vmem:[#allocation16_spill] sm:$0xff] %v3860_v0 }
  0x6f   : > { %2913 = vmatmul.msk.f32.gmra.mxu3 %vm201_vm1, %v3640_v55  ;;  %v3760_v25 = vld [vmem:[#allocation2 + $0x50] sm:$0xff] }
  0x70   : > { %2898 = vmatmul.msk.f32.gmra.mxu1 %vm201_vm1, %v3642_v56  ;;  %v3770_v27 = vld [vmem:[#allocation2 + $0x4a] sm:$0xff]  ;;  %v3784_v32 = vld [vmem:[#allocation2 + $0x52] sm:$0xff] }
  0x75   : > { %2890 = vmatmul.msk.f32.gmra.mxu0 %vm201_vm1, %v3664_v60 }
  0x76   : > { %2906 = vmatmul.msk.f32.gmra.mxu2 %vm201_vm1, %v3666_v61 }
  0x77   : > { %2914 = vmatmul.msk.f32.gmra.mxu3 %vm201_vm1, %v3668_v62 }
  0x78   : > { %2899 = vmatmul.msk.f32.gmra.mxu1 %vm201_vm1, %v3670_v63 }
  0x7d   : > { %2891 = vmatmul.msk.f32.gmra.mxu0 %vm201_vm1, %v3684_v1 }
  0x7e   : > { %2907 = vmatmul.msk.f32.gmra.mxu2 %vm201_vm1, %v3686_v2 }
  0x7f   : > { %2915 = vmatmul.msk.f32.gmra.mxu3 %vm201_vm1, %v3688_v4 }
  0x80   : > { %2900 = vmatmul.msk.f32.gmra.mxu1 %vm201_vm1, %v3690_v5 }
  0x85   : > { %2892 = vmatmul.msk.f32.gmra.mxu0 %vm201_vm1, %v3700_v6 }
  0x86   : > { %2908 = vmatmul.msk.f32.gmra.mxu2 %vm201_vm1, %v3702_v7 }
  0x87   : > { %2916 = vmatmul.msk.f32.gmra.mxu3 %vm201_vm1, %v3704_v8 }
  0x88   : > { %2918 = vmatmul.msk.f32.vlgmr.msrb.gmra.mxu1 %vm201_vm1, %v290_v9 }
  0x8d   : > { %3020 = vmatmul.msk.f32.vlgmr.msrb.gmra.mxu0 %vm201_vm1, %v3587_v38  ;;  %v3802_v38 = vld [vmem:[#allocation2 + $0x78] sm:$0xff] }
  0x8e   : > { %2952 = vmatmul.msk.f32.vlgmr.msrb.gmra.mxu2 %vm201_vm1, %v782_v10  ;;  %4677 = vst [vmem:[#allocation7_spill] sm:$0xff] %v3802_v38 }
  0x8f   : > { %2986 = vmatmul.msk.f32.vlgmr.msrb.gmra.mxu3 %vm201_vm1, %v1060_v11 }
  0x90   : > { %2919 = vmatmul.msk.f32.gmra.mxu1 %vm201_vm1, %v291_v15  ;;  %v3878_v15 = vld [vmem:[#allocation2 + $0x92] sm:$0xff] }
  0x91   : > { %4688 = vst [vmem:[#allocation18_spill] sm:$0xff] %v3878_v15 }
  0x95   : > { %3021 = vmatmul.msk.f32.gmra.mxu0 %vm201_vm1, %v3611_v46 }
  0x96   : > { %2953 = vmatmul.msk.f32.gmra.mxu2 %vm201_vm1, %v783_v16  ;;  %v3880_v16 = vld [vmem:[#allocation2 + $0xa8] sm:$0xff] }
  0x97   : > { %2987 = vmatmul.msk.f32.gmra.mxu3 %vm201_vm1, %v1061_v17  ;;  %4689 = vst [vmem:[#allocation19_spill] sm:$0xff] %v3880_v16 }
  0x98   : > { %2920 = vmatmul.msk.f32.gmra.mxu1 %vm201_vm1, %v1060_v11 }
  0x9d   : > { %3022 = vmatmul.msk.f32.gmra.mxu0 %vm201_vm1, %v3636_v53 }
  0x9e   : > { %2954 = vmatmul.msk.f32.gmra.mxu2 %vm201_vm1, %v3723_v18 }
  0x9f   : > { %2988 = vmatmul.msk.f32.gmra.mxu3 %vm201_vm1, %v3725_v19  ;;  %v3782_v31 = vpop.f32.mrf.mxu1 }
  0xa0   : > { %2921 = vmatmul.msk.f32.gmra.mxu1 %vm201_vm1, %v1061_v17 }
  0xa5   : > { %3023 = vmatmul.msk.f32.gmra.mxu0 %vm201_vm1, %v3664_v60 }
  0xa6   : > { %2955 = vmatmul.msk.f32.gmra.mxu2 %vm201_vm1, %v3734_v20 }
  0xa7   : > { %2989 = vmatmul.msk.f32.gmra.mxu3 %vm201_vm1, %v3736_v21 }
  0xa8   : > { %2922 = vmatmul.msk.f32.gmra.mxu1 %vm201_vm1, %v3725_v19 }
  0xad   : > { %3024 = vmatmul.msk.f32.gmra.mxu0 %vm201_vm1, %v3684_v1 }
  0xae   : > { %2956 = vmatmul.msk.f32.gmra.mxu2 %vm201_vm1, %v3746_v22 }
  0xaf   : > { %2990 = vmatmul.msk.f32.gmra.mxu3 %vm201_vm1, %v3748_v23 }
  0xb0   : > { %2923 = vmatmul.msk.f32.gmra.mxu1 %vm201_vm1, %v3736_v21 }
  0xb5   : > { %3025 = vmatmul.msk.f32.gmra.mxu0 %vm201_vm1, %v3700_v6 }
  0xb6   : > { %2957 = vmatmul.msk.f32.gmra.mxu2 %vm201_vm1, %v3758_v24 }
  0xb7   : > { %2991 = vmatmul.msk.f32.gmra.mxu3 %vm201_vm1, %v3760_v25 }
  0xb8   : > { %2924 = vmatmul.msk.f32.gmra.mxu1 %vm201_vm1, %v3748_v23 }
  0xbd   : > { %3026 = vmatmul.msk.f32.gmra.mxu0 %vm201_vm1, %v3416_v3  ;;  %v3792_v3 = vpop.f32.mrf.mxu0 }
  0xbe   : > { %2958 = vmatmul.msk.f32.gmra.mxu2 %vm201_vm1, %v3770_v27 }
  0xbf   : > { %2992 = vmatmul.msk.f32.gmra.mxu3 %vm201_vm1, %v3772_v29 }
  0xc0   : > { %2925 = vmatmul.msk.f32.gmra.mxu1 %vm201_vm1, %v3760_v25 }
  0xc1   : > { %v3800_v36 = vpop.f32.mrf.mxu1 }
  0xc5   : > { %3027 = vmatmul.msk.f32.gmra.mxu0 %vm201_vm1, %v3513_v14  ;;  %v3810_v14 = vpop.f32.mrf.mxu2  ;;  %v3812_v39 = vpop.f32.mrf.mxu3 }
  0xc6   : > { %2959 = vmatmul.msk.f32.gmra.mxu2 %vm201_vm1, %v3784_v32  ;;  %4678 = vst [vmem:[#allocation8_spill] sm:$0xff] %v3812_v39  ;;  %v3816_v41 = vpop.f32.mrf.mxu0  ;;  %v3900_v39 = vld [vmem:[#allocation2 + $0xb0] sm:$0xff] }
  0xc7   : > { %2993 = vmatmul.msk.f32.gmra.mxu3 %vm201_vm1, %v3786_v33  ;;  %4693 = vst [vmem:[#allocation23_spill] sm:$0xff] %v3900_v39 }
  0xc8   : > { %2926 = vmatmul.msk.f32.gmra.mxu1 %vm201_vm1, %v3772_v29 }
  0xcd   : > { %3028 = vmatmul.msk.f32.gmra.mxu0 %vm201_vm1, %v3569_v30 }
  0xce   : > { %2960 = vmatmul.msk.f32.gmra.mxu2 %vm201_vm1, %v3798_v34 }
  0xcf   : > { %2994 = vmatmul.msk.f32.gmra.mxu3 %vm201_vm1, %v3802_v38 }
  0xd0   : > { %2927 = vmatmul.msk.f32.gmra.mxu1 %vm201_vm1, %v3786_v33  ;;  %v3967_v33 = vld [vmem:[#allocation2 + $0xca] sm:$0xff] }
  0xd5   : > { %v3822_v30 = vpop.f32.mrf.mxu1  ;;  %3029 = vmatmul.msk.f32.gmra.mxu0 %vm201_vm1, %v3591_v40 }
  0xd6   : > { %2961 = vmatmul.msk.f32.gmra.mxu2 %vm201_vm1, %v3818_v42 }
  0xd7   : > { %2995 = vmatmul.msk.f32.gmra.mxu3 %vm201_vm1, %v3820_v43 }
  0xd8   : > { %2928 = vmatmul.msk.f32.gmra.mxu1 %vm201_vm1, %v3802_v38  ;;  %v3940_v38 = vld [vmem:[#allocation2 + $0xc8] sm:$0xff] }
  0xd9   : > { %v3832_v44 = vpop.f32.mrf.mxu2 }
  0xda   : > { %v3834_v45 = vpop.f32.mrf.mxu3  ;;  %v3836_v46 = vpop.f32.mrf.mxu0 }
  0xdb   : > { %4681 = vst [vmem:[#allocation11_spill] sm:$0xff] %v3834_v45  ;;  %v3898_v45 = vld [vmem:[#allocation2 + $0x9a] sm:$0xff] }
  0xdc   : > { %4692 = vst [vmem:[#allocation22_spill] sm:$0xff] %v3898_v45 }
  0xdd   : > { %v3842_v40 = vpop.f32.mrf.mxu1  ;;  %3030 = vmatmul.msk.f32.gmra.mxu0 %vm201_vm1, %v3622_v51 }
  0xde   : > { %2962 = vmatmul.msk.f32.gmra.mxu2 %vm201_vm1, %v3838_v47  ;;  %v3956_v47 = vld [vmem:[#allocation2 + $0xd8] sm:$0xff] }
  0xdf   : > { %2996 = vmatmul.msk.f32.gmra.mxu3 %vm201_vm1, %v3840_v49 }
  0xe0   : > { %2929 = vmatmul.msk.f32.gmra.mxu1 %vm201_vm1, %v3820_v43  ;;  %v3920_v43 = vld [vmem:[#allocation2 + $0xc0] sm:$0xff] }
  0xe1   : > { %v3852_v52 = vpop.f32.mrf.mxu2  ;;  %4697 = vst [vmem:[#allocation27_spill] sm:$0xff] %v3920_v43 }
  0xe2   : > { %v3854_v57 = vpop.f32.mrf.mxu3  ;;  %v3856_v58 = vpop.f32.mrf.mxu0 }
  0xe3   : > { %4684 = vst [vmem:[#allocation14_spill] sm:$0xff] %v3854_v57 }
  0xe5   : > { %v3862_v51 = vpop.f32.mrf.mxu1  ;;  %3031 = vmatmul.msk.f32.gmra.mxu0 %vm201_vm1, %v3642_v56 }
  0xe6   : > { %2963 = vmatmul.msk.f32.gmra.mxu2 %vm201_vm1, %v3858_v59  ;;  %v3938_v59 = vld [vmem:[#allocation2 + $0xb2] sm:$0xff] }
  0xe7   : > { %2997 = vmatmul.msk.f32.gmra.mxu3 %vm201_vm1, %v3860_v0  ;;  %4700 = vst [vmem:[#allocation30_spill] sm:$0xff] %v3938_v59 }
  0xe8   : > { %2930 = vmatmul.msk.f32.gmra.mxu1 %vm201_vm1, %v3840_v49 }
  0xe9   : > { %v3872_v9 = vpop.f32.mrf.mxu2 }
  0xea   : > { %v3874_v10 = vpop.f32.mrf.mxu3  ;;  %v3876_v11 = vpop.f32.mrf.mxu0 }
  0xeb   : > { %4687 = vst [vmem:[#allocation17_spill] sm:$0xff] %v3874_v10 }
  0xed   : > { %v3882_v56 = vpop.f32.mrf.mxu1  ;;  %3032 = vmatmul.msk.f32.gmra.mxu0 %vm201_vm1, %v3670_v63 }
  0xee   : > { %2964 = vmatmul.msk.f32.gmra.mxu2 %vm201_vm1, %v3878_v15  ;;  %v3918_v15 = vld [vmem:[#allocation2 + $0xaa] sm:$0xff] }
  0xef   : > { %2998 = vmatmul.msk.f32.gmra.mxu3 %vm201_vm1, %v3880_v16  ;;  %4696 = vst [vmem:[#allocation26_spill] sm:$0xff] %v3918_v15 }
  0xf0   : > { %2931 = vmatmul.msk.f32.gmra.mxu1 %vm201_vm1, %v3860_v0 }
  0xf1   : > { %v3892_v17 = vpop.f32.mrf.mxu2 }
  0xf2   : > { %4690 = vst [vmem:[#allocation20_spill] sm:$0xff] %v3892_v17  ;;  %v3894_v10 = vpop.f32.mrf.mxu3  ;;  %v3896_v57 = vpop.f32.mrf.mxu0  ;;  %v3969_v17 = vld [vmem:[#allocation2 + $0xe0] sm:$0xff] }
  0xf3   : > { %4691 = vst [vmem:[#allocation21_spill] sm:$0xff] %v3894_v10 }
  0xf5   : > { %v3902_v63 = vpop.f32.mrf.mxu1  ;;  %3033 = vmatmul.msk.f32.gmra.mxu0 %vm201_vm1, %v3690_v5 }
  0xf6   : > { %2965 = vmatmul.msk.f32.gmra.mxu2 %vm201_vm1, %v3898_v45 }
  0xf7   : > { %2999 = vmatmul.msk.f32.gmra.mxu3 %vm201_vm1, %v3900_v39 }
  0xf8   : > { %2932 = vmatmul.msk.f32.gmra.mxu1 %vm201_vm1, %v3880_v16 }
  0xf9   : > { %v3912_v10 = vpop.f32.mrf.mxu2 }
  0xfa   : > { %4694 = vst [vmem:[#allocation24_spill] sm:$0xff] %v3912_v10  ;;  %v3914_v0 = vpop.f32.mrf.mxu3  ;;  %v3916_v49 = vpop.f32.mrf.mxu0 }
  0xfb   : > { %4695 = vst [vmem:[#allocation25_spill] sm:$0xff] %v3914_v0 }
  0xfd   : > { %v3922_v5 = vpop.f32.mrf.mxu1  ;;  %3034 = vmatmul.msk.f32.gmra.mxu0 %vm201_vm1, %v3499_v12 }
  0xfe   : > { %2966 = vmatmul.msk.f32.gmra.mxu2 %vm201_vm1, %v3918_v15 }
  0xff   : > { %3000 = vmatmul.msk.f32.gmra.mxu3 %vm201_vm1, %v3920_v43 }
 0x100   : > { %2933 = vmatmul.msk.f32.gmra.mxu1 %vm201_vm1, %v3900_v39 }
 0x101   : > { %v3932_v0 = vpop.f32.mrf.mxu2 }
 0x102   : > { %4698 = vst [vmem:[#allocation28_spill] sm:$0xff] %v3932_v0  ;;  %v3934_v16 = vpop.f32.mrf.mxu3  ;;  %v3936_v45 = vpop.f32.mrf.mxu0  ;;  %v3954_v0 = vld [vmem:[#allocation2 + $0xc2] sm:$0xff] }
 0x103   : > { %4699 = vst [vmem:[#allocation29_spill] sm:$0xff] %v3934_v16 }
 0x104   : > { %4703 = vst [vmem:[#allocation33_spill] sm:$0xff] %v3954_v0 }
 0x105   : > { %v686_v12 = vpop.f32.mrf.mxu1  ;;  %3035 = vmatmul.msk.f32.gmra.mxu0 %vm201_vm1, %v3557_v26 }
 0x106   : > { %2967 = vmatmul.msk.f32.gmra.mxu2 %vm201_vm1, %v3938_v59  ;;  %v687_v26 = vadd.f32 %v686_v12, %v3792_v3 }
 0x107   : > { %3001 = vmatmul.msk.f32.gmra.mxu3 %vm201_vm1, %v3940_v38 }
 0x108   : > { %2934 = vmatmul.msk.f32.gmra.mxu1 %vm201_vm1, %v3920_v43 }
 0x109   : > { %v3950_v16 = vpop.f32.mrf.mxu2 }
 0x10a   : > { %4701 = vst [vmem:[#allocation31_spill] sm:$0xff] %v3950_v16  ;;  %v3952_v39 = vpop.f32.mrf.mxu3  ;;  %v1488_v15 = vpop.f32.mrf.mxu0 }
 0x10b   : > { %4702 = vst [vmem:[#allocation32_spill] sm:$0xff] %v3952_v39 }
 0x10d   : > { %v689_v10 = vpop.f32.mrf.mxu1  ;;  %3036 = vmatmul.msk.f32.gmra.mxu0 %vm201_vm1, %v3581_v35 }
 0x10e   : > { %2968 = vmatmul.msk.f32.gmra.mxu2 %vm201_vm1, %v3954_v0  ;;  %v690_v3 = vadd.f32 %v689_v10, %v3816_v41 }
 0x10f   : > { %3002 = vmatmul.msk.f32.gmra.mxu3 %vm201_vm1, %v3956_v47 }
 0x110   : > { %2935 = vmatmul.msk.f32.gmra.mxu1 %vm201_vm1, %v3940_v38 }
 0x111   : > { %v932_v39 = vpop.f32.mrf.mxu2 }
 0x112   : > { %v1028_v43 = vadd.f32 %v932_v39, %v687_v26  ;;  %v1210_v59 = vpop.f32.mrf.mxu3  ;;  %v1491_v16 = vpop.f32.mrf.mxu0  ;;  %v3982_v26 = vld [vmem:[#allocation2 + $0xda] sm:$0xff] }
 0x114   : > { %v1306_v42 = vadd.f32 %v1210_v59, %v1028_v43 }
 0x115   : > { %v692_v35 = vpop.f32.mrf.mxu1  ;;  %3037 = vmatmul.msk.f32.gmra.mxu0 %vm201_vm1, %v3615_v48 }
 0x116   : > { %v3973_v0 = vadd.f32 %v1488_v15, %v1306_v42  ;;  %2969 = vmatmul.msk.f32.gmra.mxu2 %vm201_vm1, %v3967_v33  ;;  %v3984_v42 = vld [vmem:[#allocation2 + $0xf0] sm:$0xff]  ;;  %v693_v41 = vadd.f32 %v692_v35, %v3836_v46 }
 0x117   : > { %3003 = vmatmul.msk.f32.gmra.mxu3 %vm201_vm1, %v3969_v17 }
 0x118   : > { %4704 = vst [vmem:[#allocation34_spill] sm:$0xff] %v3973_v0  ;;  %2936 = vmatmul.msk.f32.gmra.mxu1 %vm201_vm1, %v3956_v47 }
 0x119   : > { %v935_v39 = vpop.f32.mrf.mxu2 }
 0x11a   : > { %v1029_v43 = vadd.f32 %v935_v39, %v690_v3  ;;  %v1213_v59 = vpop.f32.mrf.mxu3  ;;  %v1494_v12 = vpop.f32.mrf.mxu0 }
 0x11c   : > { %v1307_v48 = vadd.f32 %v1213_v59, %v1029_v43  ;;  %v3997_v59 = vld [vmem:[#allocation2 + $0xe2] sm:$0xff] }
 0x11d   : > { %v695_v15 = vpop.f32.mrf.mxu1  ;;  %3038 = vmatmul.msk.f32.gmra.mxu0 %vm201_vm1, %v3638_v54 }
 0x11e   : > { %v3988_v0 = vadd.f32 %v1491_v16, %v1307_v48  ;;  %2970 = vmatmul.msk.f32.gmra.mxu2 %vm201_vm1, %v3982_v26  ;;  %v3999_v16 = vld [vmem:[#allocation2 + $0xf8] sm:$0xff]  ;;  %v696_v46 = vadd.f32 %v695_v15, %v3856_v58 }
 0x11f   : > { %3004 = vmatmul.msk.f32.gmra.mxu3 %vm201_vm1, %v3984_v42 }
 0x120   : > { %4705 = vst [vmem:[#allocation35_spill] sm:$0xff] %v3988_v0  ;;  %2937 = vmatmul.msk.f32.gmra.mxu1 %vm201_vm1, %v3969_v17 }
 0x121   : > { %v938_v10 = vpop.f32.mrf.mxu2 }
 0x122   : > { %v1030_v3 = vadd.f32 %v938_v10, %v693_v41  ;;  %v1216_v39 = vpop.f32.mrf.mxu3  ;;  %v1497_v43 = vpop.f32.mrf.mxu0 }
 0x124   : > { %v1308_v54 = vadd.f32 %v1216_v39, %v1030_v3  ;;  %v4012_v39 = vld [vmem:[#allocation2 + $0xf2] sm:$0xff] }
 0x125   : > { %v698_v48 = vpop.f32.mrf.mxu1  ;;  %3039 = vmatmul.msk.f32.gmra.mxu0 %vm201_vm1, %v3666_v61 }
 0x126   : > { %v4003_v0 = vadd.f32 %v1494_v12, %v1308_v54  ;;  %2971 = vmatmul.msk.f32.gmra.mxu2 %vm201_vm1, %v3997_v59  ;;  %v4014_v12 = vld [vmem:[#allocation2 + $0x108] sm:$0xff]  ;;  %v699_v58 = vadd.f32 %v698_v48, %v3876_v11 }
 0x127   : > { %3005 = vmatmul.msk.f32.gmra.mxu3 %vm201_vm1, %v3999_v16 }
 0x128   : > { %4706 = vst [vmem:[#allocation36_spill] sm:$0xff] %v4003_v0  ;;  %2938 = vmatmul.msk.f32.gmra.mxu1 %vm201_vm1, %v3984_v42 }
 0x129   : > { %v941_v35 = vpop.f32.mrf.mxu2 }
 0x12a   : > { %v1031_v41 = vadd.f32 %v941_v35, %v696_v46  ;;  %v1219_v10 = vpop.f32.mrf.mxu3  ;;  %v1500_v3 = vpop.f32.mrf.mxu0 }
 0x12c   : > { %v1309_v61 = vadd.f32 %v1219_v10, %v1031_v41  ;;  %v4027_v10 = vld [vmem:[#allocation2 + $0xfa] sm:$0xff] }
 0x12d   : > { %v701_v54 = vpop.f32.mrf.mxu1  ;;  %3040 = vmatmul.msk.f32.gmra.mxu0 %vm201_vm1, %v3686_v2 }
 0x12e   : > { %v4018_v0 = vadd.f32 %v1497_v43, %v1309_v61  ;;  %2972 = vmatmul.msk.f32.gmra.mxu2 %vm201_vm1, %v4012_v39  ;;  %v4029_v43 = vld [vmem:[#allocation2 + $0x110] sm:$0xff]  ;;  %v702_v11 = vadd.f32 %v701_v54, %v3896_v57 }
 0x12f   : > { %3006 = vmatmul.msk.f32.gmra.mxu3 %vm201_vm1, %v4014_v12 }
 0x130   : > { %4707 = vst [vmem:[#allocation37_spill] sm:$0xff] %v4018_v0  ;;  %2939 = vmatmul.msk.f32.gmra.mxu1 %vm201_vm1, %v3999_v16 }
 0x131   : > { %v944_v15 = vpop.f32.mrf.mxu2 }
 0x132   : > { %v1032_v46 = vadd.f32 %v944_v15, %v699_v58  ;;  %v1222_v35 = vpop.f32.mrf.mxu3  ;;  %v1503_v41 = vpop.f32.mrf.mxu0 }
 0x134   : > { %v1310_v2 = vadd.f32 %v1222_v35, %v1032_v46  ;;  %v4042_v35 = vld [vmem:[#allocation2 + $0x10a] sm:$0xff] }
 0x135   : > { %v704_v61 = vpop.f32.mrf.mxu1  ;;  %3041 = vmatmul.msk.f32.gmra.mxu0 %vm201_vm1, %v3702_v7 }
 0x136   : > { %v4033_v0 = vadd.f32 %v1500_v3, %v1310_v2  ;;  %2973 = vmatmul.msk.f32.gmra.mxu2 %vm201_vm1, %v4027_v10  ;;  %v4044_v3 = vld [vmem:[#allocation2 + $0x120] sm:$0xff]  ;;  %v705_v57 = vadd.f32 %v704_v61, %v3916_v49 }
 0x137   : > { %3007 = vmatmul.msk.f32.gmra.mxu3 %vm201_vm1, %v4029_v43 }
 0x138   : > { %4708 = vst [vmem:[#allocation38_spill] sm:$0xff] %v4033_v0  ;;  %2940 = vmatmul.msk.f32.gmra.mxu1 %vm201_vm1, %v4014_v12 }
 0x139   : > { %v947_v48 = vpop.f32.mrf.mxu2 }
 0x13a   : > { %v1033_v58 = vadd.f32 %v947_v48, %v702_v11  ;;  %v1225_v15 = vpop.f32.mrf.mxu3  ;;  %v1506_v46 = vpop.f32.mrf.mxu0 }
 0x13c   : > { %v1311_v7 = vadd.f32 %v1225_v15, %v1033_v58  ;;  %v4057_v15 = vld [vmem:[#allocation2 + $0x112] sm:$0xff] }
 0x13d   : > { %v707_v2 = vpop.f32.mrf.mxu1  ;;  %3042 = vmatmul.msk.f32.gmra.mxu0 %vm201_vm1, %v3505_v13 }
 0x13e   : > { %v4048_v0 = vadd.f32 %v1503_v41, %v1311_v7  ;;  %2974 = vmatmul.msk.f32.gmra.mxu2 %vm201_vm1, %v4042_v35  ;;  %v4059_v41 = vld [vmem:[#allocation2 + $0x128] sm:$0xff]  ;;  %v708_v49 = vadd.f32 %v707_v2, %v3936_v45 }
 0x13f   : > { %3008 = vmatmul.msk.f32.gmra.mxu3 %vm201_vm1, %v4044_v3  ;;  %4710 = vst [vmem:[#allocation40_spill] sm:$0xff] %v4059_v41 }
 0x140   : > { %4709 = vst [vmem:[#allocation39_spill] sm:$0xff] %v4048_v0  ;;  %2941 = vmatmul.msk.f32.gmra.mxu1 %vm201_vm1, %v4029_v43 }
 0x141   : > { %v950_v54 = vpop.f32.mrf.mxu2 }
 0x142   : > { %v1034_v11 = vadd.f32 %v950_v54, %v705_v57  ;;  %v1228_v48 = vpop.f32.mrf.mxu3  ;;  %v1509_v58 = vpop.f32.mrf.mxu0 }
 0x144   : > { %v1312_v13 = vadd.f32 %v1228_v48, %v1034_v11  ;;  %v4072_v48 = vld [vmem:[#allocation2 + $0x122] sm:$0xff] }
 0x145   : > { %v710_v7 = vpop.f32.mrf.mxu1  ;;  %3043 = vmatmul.msk.f32.gmra.mxu0 %vm201_vm1, %v3563_v28 }
 0x146   : > { %v4063_v0 = vadd.f32 %v1506_v46, %v1312_v13  ;;  %2975 = vmatmul.msk.f32.gmra.mxu2 %vm201_vm1, %v4057_v15  ;;  %v4074_v46 = vld [vmem:[#allocation2 + $0x138] sm:$0xff]  ;;  %v711_v45 = vadd.f32 %v710_v7, %v3782_v31  ;;  %v199_v31 = vld [vmem:[%s3396_s30 + $0xf0] sm:$0xff] }
 0x147   : > { %3009 = vmatmul.msk.f32.gmra.mxu3 %vm201_vm1, %v4059_v41  ;;  %288 = vst.msk [vmem:[#allocation2 + $0x181] sm:$0xff] %vm201_vm1, %v199_v31 }
 0x148   : > { %4711 = vst [vmem:[#allocation41_spill] sm:$0xff] %v4063_v0  ;;  %2942 = vmatmul.msk.f32.gmra.mxu1 %vm201_vm1, %v4044_v3 }
 0x149   : > { %v953_v61 = vpop.f32.mrf.mxu2 }
 0x14a   : > { %v1035_v57 = vadd.f32 %v953_v61, %v708_v49  ;;  %v1231_v54 = vpop.f32.mrf.mxu3  ;;  %v1512_v11 = vpop.f32.mrf.mxu0 }
 0x14c   : > { %v1313_v28 = vadd.f32 %v1231_v54, %v1035_v57  ;;  %v4087_v54 = vld [vmem:[#allocation2 + $0x12a] sm:$0xff] }
 0x14d   : > { %v713_v13 = vpop.f32.mrf.mxu1  ;;  %3044 = vmatmul.msk.f32.gmra.mxu0 %vm201_vm1, %v3585_v37 }
 0x14e   : > { %v4078_v0 = vadd.f32 %v1509_v58, %v1313_v28  ;;  %2976 = vmatmul.msk.f32.gmra.mxu2 %vm201_vm1, %v4072_v48  ;;  %v4089_v58 = vld [vmem:[#allocation2 + $0x140] sm:$0xff]  ;;  %v714_v7 = vadd.f32 %v713_v13, %v3800_v36  ;;  %v200_v36 = vld [vmem:[%s3396_s30 + $0xf8] sm:$0xff]  ;;  %s2880_s30 = sshll.u32 %s161_s29, 8 }
 0x14f   : > { %3010 = vmatmul.msk.f32.gmra.mxu3 %vm201_vm1, %v4074_v46  ;;  %289 = vst.msk [vmem:[#allocation2 + $0x189] sm:$0xff] %vm201_vm1, %v200_v36  ;;  %s4391_s6 = scalar_lea.vmem [#allocation3], %s2880_s30 }
 0x150   : > { %4712 = vst [vmem:[#allocation42_spill] sm:$0xff] %v4078_v0  ;;  %2943 = vmatmul.msk.f32.gmra.mxu1 %vm201_vm1, %v4059_v41  ;;  %s2811_s11 = sshll.u32 %s4391_s6, 4  ;;  %s2812_s11 = int_to_ptr.vmem [resolvable:$true] %s2811_s11 }
 0x151   : > { %v956_v2 = vpop.f32.mrf.mxu2 }
 0x152   : > { %v1036_v49 = vadd.f32 %v956_v2, %v711_v45  ;;  %v1234_v61 = vpop.f32.mrf.mxu3  ;;  %v1515_v57 = vpop.f32.mrf.mxu0 }
 0x154   : > { %v1314_v37 = vadd.f32 %v1234_v61, %v1036_v49  ;;  %v4104_v49 = vld [vmem:[#allocation2 + $0x13a] sm:$0xff] }
 0x155   : > { %v716_v28 = vpop.f32.mrf.mxu1  ;;  %3045 = vmatmul.msk.f32.gmra.mxu0 %vm201_vm1, %v3619_v50 }
 0x156   : > { %v4093_v0 = vadd.f32 %v1512_v11, %v1314_v37  ;;  %2977 = vmatmul.msk.f32.gmra.mxu2 %vm201_vm1, %v4087_v54  ;;  %v4106_v37 = vld [vmem:[#allocation2 + $0x150] sm:$0xff]  ;;  %v717_v13 = vadd.f32 %v716_v28, %v3822_v30 }
 0x157   : > { %3011 = vmatmul.msk.f32.gmra.mxu3 %vm201_vm1, %v4089_v58 }
 0x158   : > { %4713 = vst [vmem:[#allocation43_spill] sm:$0xff] %v4093_v0  ;;  %2944 = vmatmul.msk.f32.gmra.mxu1 %vm201_vm1, %v4074_v46 }
 0x159   : > { %v959_v45 = vpop.f32.mrf.mxu2 }
 0x15a   : > { %v1037_v2 = vadd.f32 %v959_v45, %v714_v7  ;;  %v1237_v50 = vpop.f32.mrf.mxu3  ;;  %v1518_v11 = vpop.f32.mrf.mxu0 }
 0x15c   : > { %v1315_v61 = vadd.f32 %v1237_v50, %v1037_v2  ;;  %v4123_v50 = vld [vmem:[#allocation2 + $0x158] sm:$0xff] }
 0x15d   : > { %v719_v0 = vpop.f32.mrf.mxu1  ;;  %3046 = vmatmul.msk.f32.gmra.mxu0 %vm201_vm1, %v3640_v55 }
 0x15e   : > { %v4110_v41 = vadd.f32 %v1515_v57, %v1315_v61  ;;  %2978 = vmatmul.msk.f32.gmra.mxu2 %vm201_vm1, %v4104_v49  ;;  %v4121_v57 = vld [vmem:[#allocation2 + $0x142] sm:$0xff]  ;;  %v720_v30 = vadd.f32 %v719_v0, %v3842_v40 }
 0x15f   : > { %3012 = vmatmul.msk.f32.gmra.mxu3 %vm201_vm1, %v4106_v37 }
 0x160   : > { %4714 = vst [vmem:[#allocation44_spill] sm:$0xff] %v4110_v41  ;;  %2945 = vmatmul.msk.f32.gmra.mxu1 %vm201_vm1, %v4089_v58 }
 0x161   : > { %v962_v31 = vpop.f32.mrf.mxu2 }
 0x162   : > { %v1038_v7 = vadd.f32 %v962_v31, %v717_v13  ;;  %v1240_v45 = vpop.f32.mrf.mxu3  ;;  %v1521_v55 = vpop.f32.mrf.mxu0 }
 0x164   : > { %v1316_v2 = vadd.f32 %v1240_v45, %v1038_v7  ;;  %v4136_v7 = vld [vmem:[#allocation2 + $0x152] sm:$0xff] }
 0x165   : > { %v722_v61 = vpop.f32.mrf.mxu1  ;;  %3047 = vmatmul.msk.f32.gmra.mxu0 %vm201_vm1, %v3668_v62 }
 0x166   : > { %v4127_v41 = vadd.f32 %v1518_v11, %v1316_v2  ;;  %2979 = vmatmul.msk.f32.gmra.mxu2 %vm201_vm1, %v4121_v57  ;;  %v4138_v11 = vld [vmem:[#allocation2 + $0x168] sm:$0xff]  ;;  %v723_v40 = vadd.f32 %v722_v61, %v3862_v51 }
 0x167   : > { %3013 = vmatmul.msk.f32.gmra.mxu3 %vm201_vm1, %v4123_v50 }
 0x168   : > { %4715 = vst [vmem:[#allocation45_spill] sm:$0xff] %v4127_v41  ;;  %2946 = vmatmul.msk.f32.gmra.mxu1 %vm201_vm1, %v4106_v37 }
 0x169   : > { %v965_v28 = vpop.f32.mrf.mxu2 }
 0x16a   : > { %v1039_v36 = vadd.f32 %v965_v28, %v720_v30  ;;  %v1243_v13 = vpop.f32.mrf.mxu3  ;;  %v1524_v31 = vpop.f32.mrf.mxu0 }
 0x16c   : > { %v1317_v62 = vadd.f32 %v1243_v13, %v1039_v36  ;;  %v4151_v13 = vld [vmem:[#allocation2 + $0x15a] sm:$0xff] }
 0x16d   : > { %v725_v45 = vpop.f32.mrf.mxu1  ;;  %3048 = vmatmul.msk.f32.gmra.mxu0 %vm201_vm1, %v3688_v4 }
 0x16e   : > { %v4142_v2 = vadd.f32 %v1521_v55, %v1317_v62  ;;  %2980 = vmatmul.msk.f32.gmra.mxu2 %vm201_vm1, %v4136_v7  ;;  %v4153_v55 = vld [vmem:[#allocation2 + $0x170] sm:$0xff]  ;;  %v726_v51 = vadd.f32 %v725_v45, %v3882_v56 }
 0x16f   : > { %3014 = vmatmul.msk.f32.gmra.mxu3 %vm201_vm1, %v4138_v11  ;;  %4717 = vst [vmem:[#allocation47_spill] sm:$0xff] %v4153_v55 }
 0x170   : > { %4716 = vst [vmem:[#allocation46_spill] sm:$0xff] %v4142_v2  ;;  %2947 = vmatmul.msk.f32.gmra.mxu1 %vm201_vm1, %v4123_v50 }
 0x171   : > { %v968_v0 = vpop.f32.mrf.mxu2 }
 0x172   : > { %v1040_v30 = vadd.f32 %v968_v0, %v723_v40  ;;  %v1246_v28 = vpop.f32.mrf.mxu3  ;;  %v1527_v36 = vpop.f32.mrf.mxu0 }
 0x174   : > { %v1318_v4 = vadd.f32 %v1246_v28, %v1040_v30  ;;  %v4166_v28 = vld [vmem:[#allocation2 + $0x181] sm:$0xff] }
 0x175   : > { %v728_v62 = vpop.f32.mrf.mxu1  ;;  %3049 = vmatmul.msk.f32.gmra.mxu0 %vm201_vm1, %v3704_v8  ;;  %4719 = vst [vmem:[#allocation49_spill] sm:$0xff] %v4166_v28  ;;  %v4168_v8 = vld [vmem:[#allocation2 + $0x16a] sm:$0xff] }
 0x176   : > { %v4157_v2 = vadd.f32 %v1524_v31, %v1318_v4  ;;  %2981 = vmatmul.msk.f32.gmra.mxu2 %vm201_vm1, %v4151_v13  ;;  %v4170_v4 = vld [vmem:[#allocation2 + $0x180] sm:$0xff]  ;;  %v729_v56 = vadd.f32 %v728_v62, %v3902_v63 }
 0x177   : > { %3015 = vmatmul.msk.f32.gmra.mxu3 %vm201_vm1, %v4153_v55  ;;  %4720 = vst [vmem:[#allocation50_spill] sm:$0xff] %v4170_v4 }
 0x178   : > { %4718 = vst [vmem:[#allocation48_spill] sm:$0xff] %v4157_v2  ;;  %2948 = vmatmul.msk.f32.gmra.mxu1 %vm201_vm1, %v4138_v11 }
 0x179   : > { %v971_v61 = vpop.f32.mrf.mxu2 }
 0x17a   : > { %v1041_v40 = vadd.f32 %v971_v61, %v726_v51  ;;  %v1249_v0 = vpop.f32.mrf.mxu3  ;;  %v1530_v30 = vpop.f32.mrf.mxu0 }
 0x17c   : > { %v1319_v31 = vadd.f32 %v1249_v0, %v1041_v40  ;;  %v4183_v0 = vld [vmem:[#allocation2 + $0x189] sm:$0xff] }
 0x17d   : > { %v731_v2 = vpop.f32.mrf.mxu1  ;;  %3050 = vmatmul.msk.f32.gmra.mxu0 %vm201_vm1, %v4166_v28  ;;  %v4185_v28 = vld [vmem:[#allocation2 + $0x172] sm:$0xff] }
 0x17e   : > { %v4174_v41 = vadd.f32 %v1527_v36, %v1319_v31  ;;  %2982 = vmatmul.msk.f32.gmra.mxu2 %vm201_vm1, %v4168_v8  ;;  %v4187_v31 = vld [vmem:[#allocation2 + $0x188] sm:$0xff]  ;;  %v732_v63 = vadd.f32 %v731_v2, %v3922_v5 }
 0x17f   : > { %3016 = vmatmul.msk.f32.gmra.mxu3 %vm201_vm1, %v4170_v4 }
 0x180   : > { %4721 = vst [vmem:[#allocation51_spill] sm:$0xff] %v4174_v41  ;;  %2949 = vmatmul.msk.f32.gmra.mxu1 %vm201_vm1, %v4153_v55 }
 0x181   : > { %v974_v45 = vpop.f32.mrf.mxu2 }
 0x182   : > { %v1042_v51 = vadd.f32 %v974_v45, %v729_v56  ;;  %v1252_v61 = vpop.f32.mrf.mxu3  ;;  %v1533_v40 = vpop.f32.mrf.mxu0 }
 0x184   : > { %v1320_v36 = vadd.f32 %v1252_v61, %v1042_v51 }
 0x185   : > { %v734_v41 = vpop.f32.mrf.mxu1  ;;  %3051 = vmatmul.msk.f32.gmra.mxu0 %vm201_vm1, %v4183_v0 }
 0x186   : > { %v4191_v4 = vadd.f32 %v1530_v30, %v1320_v36  ;;  %2983 = vmatmul.msk.f32.gmra.mxu2 %vm201_vm1, %v4185_v28  ;;  %v735_v5 = vadd.f32 %v734_v41, %v3810_v14 }
 0x187   : > { %3017 = vmatmul.msk.f32.gmra.mxu3 %vm201_vm1, %v4187_v31 }
 0x188   : > { %3054 = vmatmul.msk.f32.vlgmr.msra.gmra.mxu1 %vm201_vm1, %v3723_v18 }
 0x189   : > { %v977_v62 = vpop.f32.mrf.mxu2 }
 0x18a   : > { %v1043_v56 = vadd.f32 %v977_v62, %v732_v63  ;;  %v1255_v45 = vpop.f32.mrf.mxu3  ;;  %v1536_v51 = vpop.f32.mrf.mxu0 }
 0x18c   : > { %v1321_v61 = vadd.f32 %v1255_v45, %v1043_v56 }
 0x18d   : > { %v737_v55 = vpop.f32.mrf.mxu1  ;;  %3156 = vmatmul.msk.f32.vlgmr.msra.gmra.mxu0 %vm201_vm1, %v3746_v22 }
 0x18e   : > { %v4202_v30 = vadd.f32 %v1533_v40, %v1321_v61  ;;  %3088 = vmatmul.msk.f32.vlgmr.msra.gmra.mxu2 %vm201_vm1, %v3725_v19 }
 0x18f   : > { %3122 = vmatmul.msk.f32.vlgmr.msra.gmra.mxu3 %vm201_vm1, %v3636_v53  ;;  %v738_v53 = vadd.f32 %v737_v55, %v3832_v44 }
 0x190   : > { %3055 = vmatmul.msk.f32.gmra.mxu1 %vm201_vm1, %v3734_v20 }
 0x191   : > { %v980_v18 = vpop.f32.mrf.mxu2 }
 0x192   : > { %v1044_v2 = vadd.f32 %v980_v18, %v735_v5  ;;  %v1258_v36 = vpop.f32.mrf.mxu3  ;;  %v1539_v63 = vpop.f32.mrf.mxu0 }
 0x194   : > { %v1322_v62 = vadd.f32 %v1258_v36, %v1044_v2 }
 0x195   : > { %v740_v56 = vpop.f32.mrf.mxu1  ;;  %3157 = vmatmul.msk.f32.gmra.mxu0 %vm201_vm1, %v3758_v24 }
 0x196   : > { %v4213_v40 = vadd.f32 %v1536_v51, %v1322_v62  ;;  %3089 = vmatmul.msk.f32.gmra.mxu2 %vm201_vm1, %v3736_v21  ;;  %v2177_v62 = vld [vmem:[#allocation2 + $0x61] sm:$0xff] }
 0x197   : > { %3123 = vmatmul.msk.f32.gmra.mxu3 %vm201_vm1, %v3664_v60  ;;  %v741_v60 = vadd.f32 %v740_v56, %v3852_v52 }
 0x198   : > { %3056 = vmatmul.msk.f32.gmra.mxu1 %vm201_vm1, %v3746_v22 }
 0x199   : > { %v983_v19 = vpop.f32.mrf.mxu2 }
 0x19a   : > { %v1045_v20 = vadd.f32 %v983_v19, %v738_v53  ;;  %v1261_v14 = vpop.f32.mrf.mxu3  ;;  %v1542_v41 = vpop.f32.mrf.mxu0 }
 0x19c   : > { %v1323_v45 = vadd.f32 %v1261_v14, %v1045_v20 }
 0x19d   : > { %v743_v61 = vpop.f32.mrf.mxu1  ;;  %3158 = vmatmul.msk.f32.gmra.mxu0 %vm201_vm1, %v3770_v27 }
 0x19e   : > { %v4224_v51 = vadd.f32 %v1539_v63, %v1323_v45  ;;  %3090 = vmatmul.msk.f32.gmra.mxu2 %vm201_vm1, %v3748_v23 }
 0x19f   : > { %3124 = vmatmul.msk.f32.gmra.mxu3 %vm201_vm1, %v3684_v1  ;;  %v744_v1 = vadd.f32 %v743_v61, %v3872_v9  ;;  %v4723_v61 = vld [vmem:[#allocation9_spill] sm:$0xff] }
 0x1a0   : > { %3057 = vmatmul.msk.f32.gmra.mxu1 %vm201_vm1, %v3758_v24 }
 0x1a1   : > { %v986_v21 = vpop.f32.mrf.mxu2 }
 0x1a2   : > { %v1046_v22 = vadd.f32 %v986_v21, %v741_v60  ;;  %v1264_v44 = vpop.f32.mrf.mxu3  ;;  %v1545_v55 = vpop.f32.mrf.mxu0  ;;  %v4725_v21 = vld [vmem:[#allocation24_spill] sm:$0xff] }
 0x1a4   : > { %v1324_v5 = vadd.f32 %v1264_v44, %v1046_v22 }
 0x1a5   : > { %v746_v18 = vpop.f32.mrf.mxu1  ;;  %3159 = vmatmul.msk.f32.gmra.mxu0 %vm201_vm1, %v3784_v32 }
 0x1a6   : > { %v4235_v2 = vadd.f32 %v1542_v41, %v1324_v5  ;;  %3091 = vmatmul.msk.f32.gmra.mxu2 %vm201_vm1, %v3760_v25  ;;  %v2178_v41 = vld [vmem:[#allocation2 + $0x69] sm:$0xff] }
 0x1a7   : > { %3125 = vmatmul.msk.f32.gmra.mxu3 %vm201_vm1, %v3700_v6  ;;  %v4722_v6 = vld [vmem:[#allocation20_spill] sm:$0xff] }
 0x1a8   : > { %3058 = vmatmul.msk.f32.gmra.mxu1 %vm201_vm1, %v3770_v27  ;;  %v747_v25 = vadd.f32 %v746_v18, %v4722_v6 }
 0x1a9   : > { %v989_v23 = vpop.f32.mrf.mxu2 }
 0x1aa   : > { %v1047_v24 = vadd.f32 %v989_v23, %v744_v1  ;;  %v1267_v52 = vpop.f32.mrf.mxu3  ;;  %v1548_v36 = vpop.f32.mrf.mxu0  ;;  %v2179_v1 = vld [vmem:[#allocation2 + $0x79] sm:$0xff] }
 0x1ac   : > { %v1325_v63 = vadd.f32 %v1267_v52, %v1047_v24  ;;  %v4726_v24 = vld [vmem:[#allocation12_spill] sm:$0xff] }
 0x1ad   : > { %v749_v56 = vpop.f32.mrf.mxu1  ;;  %3160 = vmatmul.msk.f32.gmra.mxu0 %vm201_vm1, %v3798_v34 }
 0x1ae   : > { %v4246_v53 = vadd.f32 %v1545_v55, %v1325_v63  ;;  %3092 = vmatmul.msk.f32.gmra.mxu2 %vm201_vm1, %v3772_v29  ;;  %v4724_v29 = vld [vmem:[#allocation6_spill] sm:$0xff]  ;;  %v750_v22 = vadd.f32 %v749_v56, %v4725_v21  ;;  %v4728_v63 = vld [vmem:[#allocation28_spill] sm:$0xff] }
 0x1af   : > { %3126 = vmatmul.msk.f32.gmra.mxu3 %vm201_vm1, %v2177_v62 }
 0x1b0   : > { %3059 = vmatmul.msk.f32.gmra.mxu1 %vm201_vm1, %v3784_v32 }
 0x1b1   : > { %v992_v27 = vpop.f32.mrf.mxu2 }
 0x1b2   : > { %v1048_v9 = vadd.f32 %v992_v27, %v747_v25  ;;  %v1270_v19 = vpop.f32.mrf.mxu3  ;;  %v1551_v20 = vpop.f32.mrf.mxu0 }
 0x1b4   : > { %v1326_v14 = vadd.f32 %v1270_v19, %v1048_v9  ;;  %v2180_v9 = vld [vmem:[#allocation2 + $0x81] sm:$0xff] }
 0x1b5   : > { %v752_v45 = vpop.f32.mrf.mxu1  ;;  %3161 = vmatmul.msk.f32.gmra.mxu0 %vm201_vm1, %v4723_v61 }
 0x1b6   : > { %v4256_v60 = vadd.f32 %v1548_v36, %v1326_v14  ;;  %3093 = vmatmul.msk.f32.gmra.mxu2 %vm201_vm1, %v4724_v29  ;;  %v4727_v36 = vld [vmem:[#allocation7_spill] sm:$0xff]  ;;  %v753_v62 = vadd.f32 %v752_v45, %v4728_v63 }
 0x1b7   : > { %3127 = vmatmul.msk.f32.gmra.mxu3 %vm201_vm1, %v2178_v41  ;;  %v4729_v14 = vld [vmem:[#allocation15_spill] sm:$0xff]  ;;  %v4730_v41 = vld [vmem:[#allocation10_spill] sm:$0xff] }
 0x1b8   : > { %3060 = vmatmul.msk.f32.gmra.mxu1 %vm201_vm1, %v3798_v34  ;;  %v4731_v45 = vld [vmem:[#allocation31_spill] sm:$0xff] }
 0x1b9   : > { %v995_v32 = vpop.f32.mrf.mxu2 }
 0x1ba   : > { %v1049_v44 = vadd.f32 %v995_v32, %v750_v22  ;;  %v1273_v55 = vpop.f32.mrf.mxu3  ;;  %v1554_v5 = vpop.f32.mrf.mxu0 }
 0x1bc   : > { %v1327_v18 = vadd.f32 %v1273_v55, %v1049_v44  ;;  %v2181_v55 = vld [vmem:[#allocation2 + $0x91] sm:$0xff] }
 0x1bd   : > { %v755_v23 = vpop.f32.mrf.mxu1  ;;  %3162 = vmatmul.msk.f32.gmra.mxu0 %vm201_vm1, %v4726_v24 }
 0x1be   : > { %v4266_v52 = vadd.f32 %v1551_v20, %v1327_v18  ;;  %3094 = vmatmul.msk.f32.gmra.mxu2 %vm201_vm1, %v4727_v36  ;;  %v756_v29 = vadd.f32 %v755_v23, %v4731_v45  ;;  %v4733_v36 = vld [vmem:[#allocation13_spill] sm:$0xff]  ;;  %v4734_v23 = vld [vmem:[#allocation8_spill] sm:$0xff] }
 0x1bf   : > { %3128 = vmatmul.msk.f32.gmra.mxu3 %vm201_vm1, %v2179_v1  ;;  %v4732_v1 = vld [vmem:[#allocation18_spill] sm:$0xff]  ;;  %v4736_v45 = vld [vmem:[#allocation16_spill] sm:$0xff] }
 0x1c0   : > { %3061 = vmatmul.msk.f32.gmra.mxu1 %vm201_vm1, %v4723_v61 }
 0x1c1   : > { %v998_v34 = vpop.f32.mrf.mxu2 }
 0x1c2   : > { %v1050_v56 = vadd.f32 %v998_v34, %v753_v62  ;;  %v1276_v6 = vpop.f32.mrf.mxu3  ;;  %v1557_v25 = vpop.f32.mrf.mxu0 }
 0x1c4   : > { %v1328_v27 = vadd.f32 %v1276_v6, %v1050_v56 }
 0x1c5   : > { %v758_v19 = vpop.f32.mrf.mxu1  ;;  %3163 = vmatmul.msk.f32.gmra.mxu0 %vm201_vm1, %v4729_v14 }
 0x1c6   : > { %v4276_v20 = vadd.f32 %v1554_v5, %v1328_v27  ;;  %3095 = vmatmul.msk.f32.gmra.mxu2 %vm201_vm1, %v4730_v41  ;;  %v759_v63 = vadd.f32 %v758_v19, %v4734_v23  ;;  %v2182_v27 = vld [vmem:[#allocation2 + $0x99] sm:$0xff]  ;;  %v4735_v41 = vld [vmem:[#allocation22_spill] sm:$0xff] }
 0x1c7   : > { %3129 = vmatmul.msk.f32.gmra.mxu3 %vm201_vm1, %v2180_v9  ;;  %v4737_v19 = vld [vmem:[#allocation11_spill] sm:$0xff]  ;;  %v4738_v23 = vld [vmem:[#allocation26_spill] sm:$0xff] }
 0x1c8   : > { %3062 = vmatmul.msk.f32.gmra.mxu1 %vm201_vm1, %v4726_v24 }
 0x1c9   : > { %v1001_v61 = vpop.f32.mrf.mxu2 }
 0x1ca   : > { %v1051_v21 = vadd.f32 %v1001_v61, %v756_v29  ;;  %v1279_v22 = vpop.f32.mrf.mxu3  ;;  %v1560_v32 = vpop.f32.mrf.mxu0 }
 0x1cc   : > { %v1329_v44 = vadd.f32 %v1279_v22, %v1051_v21 }
 0x1cd   : > { %v761_v18 = vpop.f32.mrf.mxu1  ;;  %3164 = vmatmul.msk.f32.gmra.mxu0 %vm201_vm1, %v4732_v1 }
 0x1ce   : > { %v4286_v5 = vadd.f32 %v1557_v25, %v1329_v44  ;;  %3096 = vmatmul.msk.f32.gmra.mxu2 %vm201_vm1, %v4733_v36  ;;  %v762_v29 = vadd.f32 %v761_v18, %v4737_v19  ;;  %v4740_v18 = vld [vmem:[#allocation14_spill] sm:$0xff] }
 0x1cf   : > { %3130 = vmatmul.msk.f32.gmra.mxu3 %vm201_vm1, %v2181_v55  ;;  %v2183_v55 = vld [vmem:[#allocation2 + $0xa9] sm:$0xff] }
 0x1d0   : > { %3063 = vmatmul.msk.f32.gmra.mxu1 %vm201_vm1, %v4729_v14 }
 0x1d1   : > { %v1004_v24 = vpop.f32.mrf.mxu2 }
 0x1d2   : > { %v1052_v62 = vadd.f32 %v1004_v24, %v759_v63  ;;  %v1282_v34 = vpop.f32.mrf.mxu3  ;;  %v1563_v56 = vpop.f32.mrf.mxu0  ;;  %v4739_v63 = vld [vmem:[#allocation19_spill] sm:$0xff] }
 0x1d4   : > { %v1330_v6 = vadd.f32 %v1282_v34, %v1052_v62 }
 0x1d5   : > { %v764_v9 = vpop.f32.mrf.mxu1  ;;  %3165 = vmatmul.msk.f32.gmra.mxu0 %vm201_vm1, %v4735_v41 }
 0x1d6   : > { %v4296_v25 = vadd.f32 %v1560_v32, %v1330_v6  ;;  %3097 = vmatmul.msk.f32.gmra.mxu2 %vm201_vm1, %v4736_v45  ;;  %v765_v24 = vadd.f32 %v764_v9, %v4740_v18  ;;  %v2184_v45 = vld [vmem:[#allocation2 + $0xb1] sm:$0xff]  ;;  %v4743_v9 = vld [vmem:[#allocation17_spill] sm:$0xff] }
 0x1d7   : > { %3131 = vmatmul.msk.f32.gmra.mxu3 %vm201_vm1, %v2182_v27  ;;  %v2185_v18 = vld [vmem:[#allocation2 + $0xc1] sm:$0xff] }
 0x1d8   : > { %3064 = vmatmul.msk.f32.gmra.mxu1 %vm201_vm1, %v4732_v1 }
 0x1d9   : > { %v1007_v14 = vpop.f32.mrf.mxu2 }
 0x1da   : > { %v1053_v61 = vadd.f32 %v1007_v14, %v762_v29  ;;  %v1285_v21 = vpop.f32.mrf.mxu3  ;;  %v1566_v22 = vpop.f32.mrf.mxu0  ;;  %v4741_v29 = vld [vmem:[#allocation30_spill] sm:$0xff]  ;;  %v4742_v14 = vld [vmem:[#allocation23_spill] sm:$0xff] }
 0x1dc   : > { %v1331_v44 = vadd.f32 %v1285_v21, %v1053_v61 }
 0x1dd   : > { %v767_v36 = vpop.f32.mrf.mxu1  ;;  %3166 = vmatmul.msk.f32.gmra.mxu0 %vm201_vm1, %v4738_v23 }
 0x1de   : > { %v4306_v32 = vadd.f32 %v1563_v56, %v1331_v44  ;;  %3098 = vmatmul.msk.f32.gmra.mxu2 %vm201_vm1, %v4739_v63  ;;  %v768_v61 = vadd.f32 %v767_v36, %v4743_v9  ;;  %v4746_v36 = vld [vmem:[#allocation21_spill] sm:$0xff] }
 0x1df   : > { %3132 = vmatmul.msk.f32.gmra.mxu3 %vm201_vm1, %v2183_v55 }
 0x1e0   : > { %3065 = vmatmul.msk.f32.gmra.mxu1 %vm201_vm1, %v4735_v41 }
 0x1e1   : > { %v1010_v1 = vpop.f32.mrf.mxu2 }
 0x1e2   : > { %v1054_v62 = vadd.f32 %v1010_v1, %v765_v24  ;;  %v1288_v34 = vpop.f32.mrf.mxu3  ;;  %v1569_v6 = vpop.f32.mrf.mxu0  ;;  %v4744_v1 = vld [vmem:[#allocation33_spill] sm:$0xff] }
 0x1e4   : > { %v1332_v27 = vadd.f32 %v1288_v34, %v1054_v62  ;;  %v4745_v62 = vld [vmem:[#allocation27_spill] sm:$0xff] }
 0x1e5   : > { %v770_v19 = vpop.f32.mrf.mxu1  ;;  %3167 = vmatmul.msk.f32.gmra.mxu0 %vm201_vm1, %v4741_v29 }
 0x1e6   : > { %v4316_v56 = vadd.f32 %v1566_v22, %v1332_v27  ;;  %3099 = vmatmul.msk.f32.gmra.mxu2 %vm201_vm1, %v4742_v14  ;;  %v771_v34 = vadd.f32 %v770_v19, %v4746_v36  ;;  %v4747_v19 = vld [vmem:[#allocation25_spill] sm:$0xff]  ;;  %v2187_v36 = vld [vmem:[#allocation2 + $0xd9] sm:$0xff] }
 0x1e7   : > { %3133 = vmatmul.msk.f32.gmra.mxu3 %vm201_vm1, %v2184_v45 }
 0x1e8   : > { %3066 = vmatmul.msk.f32.gmra.mxu1 %vm201_vm1, %v4738_v23 }
 0x1e9   : > { %v1013_v41 = vpop.f32.mrf.mxu2 }
 0x1ea   : > { %v1055_v21 = vadd.f32 %v1013_v41, %v768_v61  ;;  %v1291_v44 = vpop.f32.mrf.mxu3  ;;  %v1572_v55 = vpop.f32.mrf.mxu0  ;;  %v2186_v61 = vld [vmem:[#allocation2 + $0xc9] sm:$0xff] }
 0x1ec   : > { %v1333_v63 = vadd.f32 %v1291_v44, %v1055_v21 }
 0x1ed   : > { %v773_v24 = vpop.f32.mrf.mxu1  ;;  %3168 = vmatmul.msk.f32.gmra.mxu0 %vm201_vm1, %v4744_v1 }
 0x1ee   : > { %v4326_v22 = vadd.f32 %v1569_v6, %v1333_v63  ;;  %3100 = vmatmul.msk.f32.gmra.mxu2 %vm201_vm1, %v4745_v62  ;;  %v774_v21 = vadd.f32 %v773_v24, %v4747_v19 }
 0x1ef   : > { %3134 = vmatmul.msk.f32.gmra.mxu3 %vm201_vm1, %v2185_v18 }
 0x1f0   : > { %3067 = vmatmul.msk.f32.gmra.mxu1 %vm201_vm1, %v4741_v29 }
 0x1f1   : > { %v1016_v23 = vpop.f32.mrf.mxu2 }
 0x1f2   : > { %v1056_v27 = vadd.f32 %v1016_v23, %v771_v34  ;;  %v1294_v45 = vpop.f32.mrf.mxu3  ;;  %v1575_v14 = vpop.f32.mrf.mxu0 }
 0x1f4   : > { %v1334_v9 = vadd.f32 %v1294_v45, %v1056_v27 }
 0x1f5   : > { %v776_v41 = vpop.f32.mrf.mxu1  ;;  %3169 = vmatmul.msk.f32.gmra.mxu0 %vm201_vm1, %v3967_v33 }
 0x1f6   : > { %v4336_v6 = vadd.f32 %v1572_v55, %v1334_v9  ;;  %3101 = vmatmul.msk.f32.gmra.mxu2 %vm201_vm1, %v3940_v38  ;;  %v4748_v38 = vld [vmem:[#allocation29_spill] sm:$0xff] }
 0x1f7   : > { %3135 = vmatmul.msk.f32.gmra.mxu3 %vm201_vm1, %v2186_v61  ;;  %v777_v24 = vadd.f32 %v776_v41, %v4748_v38  ;;  %v2188_v61 = vld [vmem:[#allocation2 + $0xe1] sm:$0xff] }
 0x1f8   : > { %3068 = vmatmul.msk.f32.gmra.mxu1 %vm201_vm1, %v4744_v1 }
 0x1f9   : > { %v1019_v29 = vpop.f32.mrf.mxu2 }
 0x1fa   : > { %v1057_v44 = vadd.f32 %v1019_v29, %v774_v21  ;;  %v1297_v63 = vpop.f32.mrf.mxu3  ;;  %v1578_v18 = vpop.f32.mrf.mxu0 }
 0x1fc   : > { %v1335_v62 = vadd.f32 %v1297_v63, %v1057_v44 }
 0x1fd   : > { %v779_v34 = vpop.f32.mrf.mxu1  ;;  %3170 = vmatmul.msk.f32.gmra.mxu0 %vm201_vm1, %v3982_v26 }
 0x1fe   : > { %v4346_v55 = vadd.f32 %v1575_v14, %v1335_v62  ;;  %3102 = vmatmul.msk.f32.gmra.mxu2 %vm201_vm1, %v3956_v47  ;;  %v4749_v47 = vld [vmem:[#allocation32_spill] sm:$0xff]  ;;  %v2189_v62 = vld [vmem:[#allocation2 + $0xf1] sm:$0xff] }
 0x1ff   : > { %3136 = vmatmul.msk.f32.gmra.mxu3 %vm201_vm1, %v2187_v36  ;;  %v780_v41 = vadd.f32 %v779_v34, %v4749_v47  ;;  %v4750_v36 = vld [vmem:[#allocation34_spill] sm:$0xff] }
 0x200   : > { %3069 = vmatmul.msk.f32.gmra.mxu1 %vm201_vm1, %v3967_v33 }
 0x201   : > { %v1022_v1 = vpop.f32.mrf.mxu2 }
 0x202   : > { %v1058_v23 = vadd.f32 %v1022_v1, %v777_v24  ;;  %v1300_v27 = vpop.f32.mrf.mxu3  ;;  %v1581_v45 = vpop.f32.mrf.mxu0 }
 0x204   : > { %v1336_v9 = vadd.f32 %v1300_v27, %v1058_v23  ;;  %v4380_v27 = vld [vmem:[%s4644_s2] ss:$0 sm:$0xff] }
 0x205   : > { %v1766_v19 = vpop.f32.mrf.mxu1  ;;  %3171 = vmatmul.msk.f32.gmra.mxu0 %vm201_vm1, %v3997_v59 }
 0x206   : > { %v4356_v14 = vadd.f32 %v1578_v18, %v1336_v9  ;;  %3103 = vmatmul.msk.f32.gmra.mxu2 %vm201_vm1, %v3969_v17 }
 0x207   : > { %3137 = vmatmul.msk.f32.gmra.mxu3 %vm201_vm1, %v2188_v61 }
 0x208   : > { %3070 = vmatmul.msk.f32.gmra.mxu1 %vm201_vm1, %v3982_v26  ;;  %v1862_v26 = vadd.f32 %v1766_v19, %v4750_v36 }
 0x209   : > { %v1025_v33 = vpop.f32.mrf.mxu2 }
 0x20a   : > { %v1059_v21 = vadd.f32 %v1025_v33, %v780_v41  ;;  %v1303_v29 = vpop.f32.mrf.mxu3  ;;  %v2601_v44 = vpop.f32.mrf.mxu0 }
 0x20c   : > { %v1337_v63 = vadd.f32 %v1303_v29, %v1059_v21  ;;  %v2191_v29 = vld [vmem:[#allocation2 + $0x109] sm:$0xff] }
 0x20d   : > { %v1769_v18 = vpop.f32.mrf.mxu1  ;;  %3172 = vmatmul.msk.f32.gmra.mxu0 %vm201_vm1, %v4012_v39 }
 0x20e   : > { %v4366_v17 = vadd.f32 %v1581_v45, %v1337_v63  ;;  %3104 = vmatmul.msk.f32.gmra.mxu2 %vm201_vm1, %v3984_v42  ;;  %v2190_v42 = vld [vmem:[#allocation2 + $0xf9] sm:$0xff] }
 0x20f   : > { %3138 = vmatmul.msk.f32.gmra.mxu3 %vm201_vm1, %v2189_v62 }
 0x210   : > { %3071 = vmatmul.msk.f32.gmra.mxu1 %vm201_vm1, %v3997_v59  ;;  %v4751_v59 = vld [vmem:[#allocation35_spill] sm:$0xff] }
 0x211   : > { %v2045_v34 = vpop.f32.mrf.mxu2  ;;  %v1863_v61 = vadd.f32 %v1769_v18, %v4751_v59 }
 0x212   : > { %v2141_v38 = vadd.f32 %v2045_v34, %v1862_v26  ;;  %v2323_v24 = vpop.f32.mrf.mxu3  ;;  %v2604_v1 = vpop.f32.mrf.mxu0 }
 0x214   : > { %v2419_v23 = vadd.f32 %v2323_v24, %v2141_v38 }
 0x215   : > { %v1772_v45 = vpop.f32.mrf.mxu1  ;;  %3173 = vmatmul.msk.f32.gmra.mxu0 %vm201_vm1, %v4027_v10 }
 0x216   : > { %v2697_v9 = vadd.f32 %v2601_v44, %v2419_v23  ;;  %3105 = vmatmul.msk.f32.gmra.mxu2 %vm201_vm1, %v3999_v16 }
 0x217   : > { %3139 = vmatmul.msk.f32.gmra.mxu3 %vm201_vm1, %v2190_v42 }
 0x218   : > { %v2733_v19 = vadd.f32 %v4380_v27, %v2697_v9  ;;  %3072 = vmatmul.msk.f32.gmra.mxu1 %vm201_vm1, %v4012_v39  ;;  %v4752_v39 = vld [vmem:[#allocation36_spill] sm:$0xff] }
 0x219   : > { %v2048_v47 = vpop.f32.mrf.mxu2  ;;  %v1864_v62 = vadd.f32 %v1772_v45, %v4752_v39 }
 0x21a   : > { %2766 = vst.msk [vmem:[%s4391_s6] sm:$0xff] %vm2765_vm3, %v2733_v19  ;;  %v2142_v41 = vadd.f32 %v2048_v47, %v1863_v61  ;;  %v2326_v33 = vpop.f32.mrf.mxu3  ;;  %v2607_v16 = vpop.f32.mrf.mxu0 }
 0x21c   : > { %v2420_v21 = vadd.f32 %v2326_v33, %v2142_v41  ;;  %v2193_v41 = vld [vmem:[#allocation2 + $0x121] sm:$0xff] }
 0x21d   : > { %v1775_v44 = vpop.f32.mrf.mxu1  ;;  %3174 = vmatmul.msk.f32.gmra.mxu0 %vm201_vm1, %v4042_v35 }
 0x21e   : > { %v2698_v63 = vadd.f32 %v2604_v1, %v2420_v21  ;;  %3106 = vmatmul.msk.f32.gmra.mxu2 %vm201_vm1, %v4014_v12  ;;  %v2192_v1 = vld [vmem:[#allocation2 + $0x111] sm:$0xff] }
 0x21f   : > { %3140 = vmatmul.msk.f32.gmra.mxu3 %vm201_vm1, %v2191_v29 }
 0x220   : > { %v2734_v18 = vadd.f32 %v4380_v27, %v2698_v63  ;;  %3073 = vmatmul.msk.f32.gmra.mxu1 %vm201_vm1, %v4027_v10  ;;  %v4753_v10 = vld [vmem:[#allocation37_spill] sm:$0xff] }
 0x221   : > { %v2051_v36 = vpop.f32.mrf.mxu2  ;;  %v1865_v42 = vadd.f32 %v1775_v44, %v4753_v10 }
 0x222   : > { %2767 = vst.msk [vmem:[%s4391_s6 + $0x8] sm:$0xff] %vm2765_vm3, %v2734_v18  ;;  %v2143_v26 = vadd.f32 %v2051_v36, %v1864_v62  ;;  %v2329_v34 = vpop.f32.mrf.mxu3  ;;  %v2610_v38 = vpop.f32.mrf.mxu0  ;;  %v2194_v18 = vld [vmem:[#allocation2 + $0x129] sm:$0xff] }
 0x224   : > { %v2421_v24 = vadd.f32 %v2329_v34, %v2143_v26  ;;  %v4755_v26 = vld [vmem:[#allocation40_spill] sm:$0xff] }
 0x225   : > { %v1778_v23 = vpop.f32.mrf.mxu1  ;;  %3175 = vmatmul.msk.f32.gmra.mxu0 %vm201_vm1, %v4057_v15 }
 0x226   : > { %v2699_v12 = vadd.f32 %v2607_v16, %v2421_v24  ;;  %3107 = vmatmul.msk.f32.gmra.mxu2 %vm201_vm1, %v4029_v43 }
 0x227   : > { %3141 = vmatmul.msk.f32.gmra.mxu3 %vm201_vm1, %v2192_v1 }
 0x228   : > { %v2735_v45 = vadd.f32 %v4380_v27, %v2699_v12  ;;  %3074 = vmatmul.msk.f32.gmra.mxu1 %vm201_vm1, %v4042_v35  ;;  %v4754_v35 = vld [vmem:[#allocation38_spill] sm:$0xff] }
 0x229   : > { %v2054_v9 = vpop.f32.mrf.mxu2  ;;  %v1866_v16 = vadd.f32 %v1778_v23, %v4754_v35  ;;  %v2196_v35 = vld [vmem:[#allocation2 + $0x141] sm:$0xff] }
 0x22a   : > { %2768 = vst.msk [vmem:[%s4391_s6 + $0x10] sm:$0xff] %vm2765_vm3, %v2735_v45  ;;  %v2144_v59 = vadd.f32 %v2054_v9, %v1865_v42  ;;  %v2332_v61 = vpop.f32.mrf.mxu3  ;;  %v2613_v19 = vpop.f32.mrf.mxu0  ;;  %v2195_v42 = vld [vmem:[#allocation2 + $0x139] sm:$0xff] }
 0x22c   : > { %v2422_v47 = vadd.f32 %v2332_v61, %v2144_v59 }
 0x22d   : > { %v1781_v33 = vpop.f32.mrf.mxu1  ;;  %3176 = vmatmul.msk.f32.gmra.mxu0 %vm201_vm1, %v4072_v48 }
 0x22e   : > { %v2700_v43 = vadd.f32 %v2610_v38, %v2422_v47  ;;  %3108 = vmatmul.msk.f32.gmra.mxu2 %vm201_vm1, %v4044_v3 }
 0x22f   : > { %3142 = vmatmul.msk.f32.gmra.mxu3 %vm201_vm1, %v2193_v41 }
 0x230   : > { %v2736_v21 = vadd.f32 %v4380_v27, %v2700_v43  ;;  %3075 = vmatmul.msk.f32.gmra.mxu1 %vm201_vm1, %v4057_v15  ;;  %v4756_v15 = vld [vmem:[#allocation39_spill] sm:$0xff] }
 0x231   : > { %v2057_v29 = vpop.f32.mrf.mxu2  ;;  %v1867_v34 = vadd.f32 %v1781_v33, %v4756_v15 }
 0x232   : > { %2769 = vst.msk [vmem:[%s4391_s6 + $0x18] sm:$0xff] %vm2765_vm3, %v2736_v21  ;;  %v2145_v44 = vadd.f32 %v2057_v29, %v1866_v16  ;;  %v2335_v63 = vpop.f32.mrf.mxu3  ;;  %v2616_v39 = vpop.f32.mrf.mxu0 }
 0x234   : > { %v2423_v62 = vadd.f32 %v2335_v63, %v2145_v44 }
 0x235   : > { %v1784_v36 = vpop.f32.mrf.mxu1  ;;  %3177 = vmatmul.msk.f32.gmra.mxu0 %vm201_vm1, %v4087_v54 }
 0x236   : > { %v2701_v3 = vadd.f32 %v2613_v19, %v2423_v62  ;;  %3109 = vmatmul.msk.f32.gmra.mxu2 %vm201_vm1, %v4755_v26 }
 0x237   : > { %3143 = vmatmul.msk.f32.gmra.mxu3 %vm201_vm1, %v2194_v18 }
 0x238   : > { %v2737_v38 = vadd.f32 %v4380_v27, %v2701_v3  ;;  %3076 = vmatmul.msk.f32.gmra.mxu1 %vm201_vm1, %v4072_v48  ;;  %v4757_v48 = vld [vmem:[#allocation41_spill] sm:$0xff] }
 0x239   : > { %v2060_v24 = vpop.f32.mrf.mxu2  ;;  %v1868_v59 = vadd.f32 %v1784_v36, %v4757_v48  ;;  %v2197_v36 = vld [vmem:[#allocation2 + $0x151] sm:$0xff] }
 0x23a   : > { %2770 = vst.msk [vmem:[%s4391_s6 + $0x20] sm:$0xff] %vm2765_vm3, %v2737_v38  ;;  %v2146_v1 = vadd.f32 %v2060_v24, %v1867_v34  ;;  %v2338_v23 = vpop.f32.mrf.mxu3  ;;  %v2619_v12 = vpop.f32.mrf.mxu0 }
 0x23c   : > { %v2424_v10 = vadd.f32 %v2338_v23, %v2146_v1 }
 0x23d   : > { %v1787_v45 = vpop.f32.mrf.mxu1  ;;  %3178 = vmatmul.msk.f32.gmra.mxu0 %vm201_vm1, %v4104_v49 }
 0x23e   : > { %v2702_v9 = vadd.f32 %v2616_v39, %v2424_v10  ;;  %3110 = vmatmul.msk.f32.gmra.mxu2 %vm201_vm1, %v4074_v46 }
 0x23f   : > { %3144 = vmatmul.msk.f32.gmra.mxu3 %vm201_vm1, %v2195_v42 }
 0x240   : > { %v2738_v61 = vadd.f32 %v4380_v27, %v2702_v9  ;;  %3077 = vmatmul.msk.f32.gmra.mxu1 %vm201_vm1, %v4087_v54  ;;  %v4758_v54 = vld [vmem:[#allocation42_spill] sm:$0xff] }
 0x241   : > { %v2063_v19 = vpop.f32.mrf.mxu2  ;;  %v1869_v21 = vadd.f32 %v1787_v45, %v4758_v54 }
 0x242   : > { %2771 = vst.msk [vmem:[%s4391_s6 + $0x28] sm:$0xff] %vm2765_vm3, %v2738_v61  ;;  %v2147_v47 = vadd.f32 %v2063_v19, %v1868_v59  ;;  %v2341_v41 = vpop.f32.mrf.mxu3  ;;  %v2622_v33 = vpop.f32.mrf.mxu0 }
 0x244   : > { %v2425_v43 = vadd.f32 %v2341_v41, %v2147_v47  ;;  %v2199_v47 = vld [vmem:[#allocation2 + $0x169] sm:$0xff] }
 0x245   : > { %v1790_v16 = vpop.f32.mrf.mxu1  ;;  %3179 = vmatmul.msk.f32.gmra.mxu0 %vm201_vm1, %v4121_v57 }
 0x246   : > { %v2703_v46 = vadd.f32 %v2619_v12, %v2425_v43  ;;  %3111 = vmatmul.msk.f32.gmra.mxu2 %vm201_vm1, %v4089_v58  ;;  %v2198_v12 = vld [vmem:[#allocation2 + $0x159] sm:$0xff] }
 0x247   : > { %3145 = vmatmul.msk.f32.gmra.mxu3 %vm201_vm1, %v2196_v35 }
 0x248   : > { %v2739_v29 = vadd.f32 %v4380_v27, %v2703_v46  ;;  %3078 = vmatmul.msk.f32.gmra.mxu1 %vm201_vm1, %v4104_v49  ;;  %v4759_v49 = vld [vmem:[#allocation43_spill] sm:$0xff] }
 0x249   : > { %v2066_v44 = vpop.f32.mrf.mxu2  ;;  %v1870_v26 = vadd.f32 %v1790_v16, %v4759_v49  ;;  %v2479_v49 = vld [vmem:[#allocation2 + $0x182] sm:$0xff] }
 0x24a   : > { %2772 = vst.msk [vmem:[%s4391_s6 + $0x30] sm:$0xff] %vm2765_vm3, %v2739_v29  ;;  %v2148_v63 = vadd.f32 %v2066_v44, %v1869_v21  ;;  %v2344_v39 = vpop.f32.mrf.mxu3  ;;  %v2625_v62 = vpop.f32.mrf.mxu0  ;;  %v2200_v29 = vld [vmem:[#allocation2 + $0x171] sm:$0xff] }
 0x24c   : > { %v2426_v18 = vadd.f32 %v2344_v39, %v2148_v63  ;;  %v4762_v63 = vld [vmem:[#allocation47_spill] sm:$0xff] }
 0x24d   : > { %v1793_v3 = vpop.f32.mrf.mxu1  ;;  %3180 = vmatmul.msk.f32.gmra.mxu0 %vm201_vm1, %v4136_v7 }
 0x24e   : > { %v2704_v58 = vadd.f32 %v2622_v33, %v2426_v18  ;;  %3112 = vmatmul.msk.f32.gmra.mxu2 %vm201_vm1, %v4106_v37 }
 0x24f   : > { %3146 = vmatmul.msk.f32.gmra.mxu3 %vm201_vm1, %v2197_v36 }
 0x250   : > { %v2740_v15 = vadd.f32 %v4380_v27, %v2704_v58  ;;  %3079 = vmatmul.msk.f32.gmra.mxu1 %vm201_vm1, %v4121_v57  ;;  %v4760_v57 = vld [vmem:[#allocation44_spill] sm:$0xff] }
 0x251   : > { %v2069_v34 = vpop.f32.mrf.mxu2  ;;  %v1871_v42 = vadd.f32 %v1793_v3, %v4760_v57 }
 0x252   : > { %2773 = vst.msk [vmem:[%s4391_s6 + $0x38] sm:$0xff] %vm2765_vm3, %v2740_v15  ;;  %v2149_v38 = vadd.f32 %v2069_v34, %v1870_v26  ;;  %v2347_v24 = vpop.f32.mrf.mxu3  ;;  %v2628_v1 = vpop.f32.mrf.mxu0 }
 0x254   : > { %v2427_v23 = vadd.f32 %v2347_v24, %v2149_v38  ;;  %v4764_v38 = vld [vmem:[#allocation50_spill] sm:$0xff]  ;;  %v4765_v24 = vld [vmem:[#allocation49_spill] sm:$0xff] }
 0x255   : > { %v1796_v10 = vpop.f32.mrf.mxu1  ;;  %3181 = vmatmul.msk.f32.gmra.mxu0 %vm201_vm1, %v4151_v13 }
 0x256   : > { %v2705_v37 = vadd.f32 %v2625_v62, %v2427_v23  ;;  %3113 = vmatmul.msk.f32.gmra.mxu2 %vm201_vm1, %v4123_v50 }
 0x257   : > { %3147 = vmatmul.msk.f32.gmra.mxu3 %vm201_vm1, %v2198_v12 }
 0x258   : > { %v2741_v45 = vadd.f32 %v4380_v27, %v2705_v37  ;;  %3080 = vmatmul.msk.f32.gmra.mxu1 %vm201_vm1, %v4136_v7  ;;  %v4761_v7 = vld [vmem:[#allocation45_spill] sm:$0xff] }
 0x259   : > { %v2072_v9 = vpop.f32.mrf.mxu2  ;;  %v1872_v33 = vadd.f32 %v1796_v10, %v4761_v7  ;;  %v2481_v7 = vld [vmem:[#allocation2 + $0x19a] sm:$0xff] }
 0x25a   : > { %2774 = vst.msk [vmem:[%s4391_s6 + $0x40] sm:$0xff] %vm2765_vm3, %v2741_v45  ;;  %v2150_v48 = vadd.f32 %v2072_v9, %v1871_v42  ;;  %v2350_v59 = vpop.f32.mrf.mxu3  ;;  %v2631_v61 = vpop.f32.mrf.mxu0  ;;  %v2480_v42 = vld [vmem:[#allocation2 + $0x18a] sm:$0xff] }
 0x25c   : > { %v2428_v19 = vadd.f32 %v2350_v59, %v2150_v48 }
 0x25d   : > { %v1799_v41 = vpop.f32.mrf.mxu1  ;;  %3182 = vmatmul.msk.f32.gmra.mxu0 %vm201_vm1, %v4168_v8 }
 0x25e   : > { %v2706_v50 = vadd.f32 %v2628_v1, %v2428_v19  ;;  %3114 = vmatmul.msk.f32.gmra.mxu2 %vm201_vm1, %v4138_v11 }
 0x25f   : > { %3148 = vmatmul.msk.f32.gmra.mxu3 %vm201_vm1, %v2199_v47 }
 0x260   : > { %v2742_v43 = vadd.f32 %v4380_v27, %v2706_v50  ;;  %3081 = vmatmul.msk.f32.gmra.mxu1 %vm201_vm1, %v4151_v13  ;;  %v4763_v13 = vld [vmem:[#allocation46_spill] sm:$0xff] }
 0x261   : > { %v2075_v35 = vpop.f32.mrf.mxu2  ;;  %v1873_v39 = vadd.f32 %v1799_v41, %v4763_v13 }
 0x262   : > { %2775 = vst.msk [vmem:[%s4391_s6 + $0x48] sm:$0xff] %vm2765_vm3, %v2742_v43  ;;  %v2151_v16 = vadd.f32 %v2075_v35, %v1872_v33  ;;  %v2353_v46 = vpop.f32.mrf.mxu3  ;;  %v2634_v54 = vpop.f32.mrf.mxu0  ;;  %v1925_v33 = vld [vmem:[#allocation2 + $0x198] sm:$0xff] }
 0x264   : > { %v2429_v21 = vadd.f32 %v2353_v46, %v2151_v16 }
 0x265   : > { %v1802_v44 = vpop.f32.mrf.mxu1  ;;  %3183 = vmatmul.msk.f32.gmra.mxu0 %vm201_vm1, %v4185_v28 }
 0x266   : > { %v2707_v11 = vadd.f32 %v2631_v61, %v2429_v21  ;;  %3115 = vmatmul.msk.f32.gmra.mxu2 %vm201_vm1, %v4762_v63  ;;  %v1926_v63 = vld [vmem:[#allocation2 + $0x1a0] sm:$0xff] }
 0x267   : > { %3149 = vmatmul.msk.f32.gmra.mxu3 %vm201_vm1, %v2200_v29 }
 0x268   : > { %v2743_v62 = vadd.f32 %v4380_v27, %v2707_v11  ;;  %3082 = vmatmul.msk.f32.gmra.mxu1 %vm201_vm1, %v4168_v8  ;;  %v4766_v8 = vld [vmem:[#allocation48_spill] sm:$0xff] }
 0x269   : > { %v2078_v18 = vpop.f32.mrf.mxu2  ;;  %v1874_v1 = vadd.f32 %v1802_v44, %v4766_v8  ;;  %v2482_v11 = vld [vmem:[#allocation2 + $0x1a2] sm:$0xff] }
 0x26a   : > { %2776 = vst.msk [vmem:[%s4391_s6 + $0x50] sm:$0xff] %vm2765_vm3, %v2743_v62  ;;  %v2152_v36 = vadd.f32 %v2078_v18, %v1873_v39  ;;  %v2356_v3 = vpop.f32.mrf.mxu3  ;;  %v2637_v58 = vpop.f32.mrf.mxu0  ;;  %v2204_v39 = vld [vmem:[#allocation2 + $0x1a1] sm:$0xff] }
 0x26c   : > { %v2430_v26 = vadd.f32 %v2356_v3, %v2152_v36 }
 0x26d   : > { %v1805_v15 = vpop.f32.mrf.mxu1  ;;  %3184 = vmatmul.msk.f32.gmra.mxu0 %vm201_vm1, %v2479_v49 }
 0x26e   : > { %v2708_v34 = vadd.f32 %v2634_v54, %v2430_v26  ;;  %3116 = vmatmul.msk.f32.gmra.mxu2 %vm201_vm1, %v4764_v38 }
 0x26f   : > { %3150 = vmatmul.msk.f32.gmra.mxu3 %vm201_vm1, %v4765_v24 }
 0x270   : > { %v2744_v23 = vadd.f32 %v4380_v27, %v2708_v34  ;;  %3083 = vmatmul.msk.f32.gmra.mxu1 %vm201_vm1, %v4185_v28  ;;  %v4767_v28 = vld [vmem:[#allocation51_spill] sm:$0xff] }
 0x271   : > { %v2081_v12 = vpop.f32.mrf.mxu2  ;;  %v1875_v59 = vadd.f32 %v1805_v15, %v4767_v28 }
 0x272   : > { %2777 = vst.msk [vmem:[%s4391_s6 + $0x58] sm:$0xff] %vm2765_vm3, %v2744_v23  ;;  %v2153_v10 = vadd.f32 %v2081_v12, %v1874_v1  ;;  %v2359_v37 = vpop.f32.mrf.mxu3  ;;  %v2640_v57 = vpop.f32.mrf.mxu0 }
 0x274   : > { %v2431_v45 = vadd.f32 %v2359_v37, %v2153_v10 }
 0x275   : > { %v1808_v9 = vpop.f32.mrf.mxu1  ;;  %3185 = vmatmul.msk.f32.gmra.mxu0 %vm201_vm1, %v2480_v42 }
 0x276   : > { %v2709_v48 = vadd.f32 %v2637_v58, %v2431_v45  ;;  %3117 = vmatmul.msk.f32.gmra.mxu2 %vm201_vm1, %v4187_v31  ;;  %v2203_v31 = vld [vmem:[#allocation2 + $0x199] sm:$0xff]  ;;  %v1876_v16 = vadd.f32 %v1808_v9, %v4191_v4 }
 0x277   : > { %3151 = vmatmul.msk.f32.gmra.mxu3 %vm201_vm1, %v4183_v0 }
 0x278   : > { %v2745_v61 = vadd.f32 %v4380_v27, %v2709_v48  ;;  %3084 = vmatmul.msk.f32.gmra.mxu1 %vm201_vm1, %v2479_v49 }
 0x279   : > { %v2084_v19 = vpop.f32.mrf.mxu2 }
 0x27a   : > { %2778 = vst.msk [vmem:[%s4391_s6 + $0x60] sm:$0xff] %vm2765_vm3, %v2745_v61  ;;  %v2154_v47 = vadd.f32 %v2084_v19, %v1875_v59  ;;  %v2362_v41 = vpop.f32.mrf.mxu3  ;;  %v2643_v50 = vpop.f32.mrf.mxu0 }
 0x27c   : > { %v2432_v43 = vadd.f32 %v2362_v41, %v2154_v47 }
 0x27d   : > { %v1811_v35 = vpop.f32.mrf.mxu1  ;;  %3186 = vmatmul.msk.f32.gmra.mxu0 %vm201_vm1, %v2481_v7 }
 0x27e   : > { %v2710_v0 = vadd.f32 %v2640_v57, %v2432_v43  ;;  %3118 = vmatmul.msk.f32.gmra.mxu2 %vm201_vm1, %v1925_v33  ;;  %v1877_v4 = vadd.f32 %v1811_v35, %v4202_v30 }
 0x27f   : > { %3152 = vmatmul.msk.f32.gmra.mxu3 %vm201_vm1, %v2203_v31 }
 0x280   : > { %v2746_v46 = vadd.f32 %v4380_v27, %v2710_v0  ;;  %3085 = vmatmul.msk.f32.gmra.mxu1 %vm201_vm1, %v2480_v42 }
 0x281   : > { %v2087_v54 = vpop.f32.mrf.mxu2 }
 0x282   : > { %2779 = vst.msk [vmem:[%s4391_s6 + $0x68] sm:$0xff] %vm2765_vm3, %v2746_v46  ;;  %v2155_v21 = vadd.f32 %v2087_v54, %v1876_v16  ;;  %v2365_v29 = vpop.f32.mrf.mxu3  ;;  %v2646_v44 = vpop.f32.mrf.mxu0 }
 0x284   : > { %v2433_v13 = vadd.f32 %v2365_v29, %v2155_v21 }
 0x285   : > { %v1814_v62 = vpop.f32.mrf.mxu1  ;;  %3187 = vmatmul.msk.f32.gmra.mxu0 %vm201_vm1, %v2482_v11 }
 0x286   : > { %v2711_v18 = vadd.f32 %v2643_v50, %v2433_v13  ;;  %3119 = vmatmul.msk.f32.gmra.mxu2 %vm201_vm1, %v1926_v63  ;;  %v1878_v24 = vadd.f32 %v1814_v62, %v4213_v40 }
 0x287   : > { %3153 = vmatmul.msk.f32.gmra.mxu3 %vm201_vm1, %v2204_v39 }
 0x288   : > { %v2747_v36 = vadd.f32 %v4380_v27, %v2711_v18 }
 0x289   : > { %v2090_v3 = vpop.f32.mrf.mxu2 }
 0x28a   : > { %2780 = vst.msk [vmem:[%s4391_s6 + $0x70] sm:$0xff] %vm2765_vm3, %v2747_v36  ;;  %v2156_v58 = vadd.f32 %v2090_v3, %v1877_v4  ;;  %v2368_v49 = vpop.f32.mrf.mxu3  ;;  %v2649_v26 = vpop.f32.mrf.mxu0 }
 0x28c   : > { %v2434_v15 = vadd.f32 %v2368_v49, %v2156_v58 }
 0x28d   : > { %v1817_v34 = vpop.f32.mrf.mxu1 }
 0x28e   : > { %v2712_v38 = vadd.f32 %v2646_v44, %v2434_v15  ;;  %v1879_v42 = vadd.f32 %v1817_v34, %v4224_v51 }
 0x290   : > { %v2748_v8 = vadd.f32 %v4380_v27, %v2712_v38 }
 0x291   : > { %v2093_v1 = vpop.f32.mrf.mxu2 }
 0x292   : > { %2781 = vst.msk [vmem:[%s4391_s6 + $0x78] sm:$0xff] %vm2765_vm3, %v2748_v8  ;;  %v2157_v30 = vadd.f32 %v2093_v1, %v1878_v24  ;;  %v2371_v23 = vpop.f32.mrf.mxu3  ;;  %v2652_v12 = vpop.f32.mrf.mxu0 }
 0x294   : > { %v2435_v10 = vadd.f32 %v2371_v23, %v2157_v30 }
 0x295   : > { %v1820_v37 = vpop.f32.mrf.mxu1 }
 0x296   : > { %v2713_v57 = vadd.f32 %v2649_v26, %v2435_v10  ;;  %v1880_v47 = vadd.f32 %v1820_v37, %v4235_v2 }
 0x298   : > { %v2749_v45 = vadd.f32 %v4380_v27, %v2713_v57 }
 0x299   : > { %v2096_v9 = vpop.f32.mrf.mxu2 }
 0x29a   : > { %2782 = vst.msk [vmem:[%s4391_s6 + $0x80] sm:$0xff] %vm2765_vm3, %v2749_v45  ;;  %v2158_v40 = vadd.f32 %v2096_v9, %v1879_v42  ;;  %v2374_v48 = vpop.f32.mrf.mxu3  ;;  %v2655_v28 = vpop.f32.mrf.mxu0 }
 0x29c   : > { %v2436_v59 = vadd.f32 %v2374_v48, %v2158_v40 }
 0x29d   : > { %v1823_v61 = vpop.f32.mrf.mxu1 }
 0x29e   : > { %v2714_v19 = vadd.f32 %v2652_v12, %v2436_v59  ;;  %v1881_v0 = vadd.f32 %v1823_v61, %v4246_v53 }
 0x2a0   : > { %v2750_v41 = vadd.f32 %v4380_v27, %v2714_v19 }
 0x2a1   : > { %v2099_v50 = vpop.f32.mrf.mxu2 }
 0x2a2   : > { %2783 = vst.msk [vmem:[%s4391_s6 + $0x88] sm:$0xff] %vm2765_vm3, %v2750_v41  ;;  %v2159_v51 = vadd.f32 %v2099_v50, %v1880_v47  ;;  %v2377_v7 = vpop.f32.mrf.mxu3  ;;  %v2658_v33 = vpop.f32.mrf.mxu0 }
 0x2a4   : > { %v2437_v43 = vadd.f32 %v2377_v7, %v2159_v51 }
 0x2a5   : > { %v1826_v31 = vpop.f32.mrf.mxu1 }
 0x2a6   : > { %v2715_v35 = vadd.f32 %v2655_v28, %v2437_v43  ;;  %v1882_v63 = vadd.f32 %v1826_v31, %v4256_v60 }
 0x2a8   : > { %v2751_v16 = vadd.f32 %v4380_v27, %v2715_v35 }
 0x2a9   : > { %v2102_v46 = vpop.f32.mrf.mxu2 }
 0x2aa   : > { %2784 = vst.msk [vmem:[%s4391_s6 + $0x90] sm:$0xff] %vm2765_vm3, %v2751_v16  ;;  %v2160_v2 = vadd.f32 %v2102_v46, %v1881_v0  ;;  %v2380_v54 = vpop.f32.mrf.mxu3  ;;  %v2661_v21 = vpop.f32.mrf.mxu0 }
 0x2ac   : > { %v2438_v29 = vadd.f32 %v2380_v54, %v2160_v2 }
 0x2ad   : > { %v1829_v44 = vpop.f32.mrf.mxu1 }
 0x2ae   : > { %v2716_v11 = vadd.f32 %v2658_v33, %v2438_v29  ;;  %v1883_v58 = vadd.f32 %v1829_v44, %v4266_v52 }
 0x2b0   : > { %v2752_v13 = vadd.f32 %v4380_v27, %v2716_v11 }
 0x2b1   : > { %v2105_v39 = vpop.f32.mrf.mxu2 }
 0x2b2   : > { %2785 = vst.msk [vmem:[%s4391_s6 + $0x98] sm:$0xff] %vm2765_vm3, %v2752_v13  ;;  %v2161_v53 = vadd.f32 %v2105_v39, %v1882_v63  ;;  %v2383_v62 = vpop.f32.mrf.mxu3  ;;  %v2664_v18 = vpop.f32.mrf.mxu0 }
 0x2b4   : > { %v2439_v4 = vadd.f32 %v2383_v62, %v2161_v53 }
 0x2b5   : > { %v1832_v36 = vpop.f32.mrf.mxu1 }
 0x2b6   : > { %v2717_v3 = vadd.f32 %v2661_v21, %v2439_v4  ;;  %v1884_v1 = vadd.f32 %v1832_v36, %v4276_v20 }
 0x2b8   : > { %v2753_v49 = vadd.f32 %v4380_v27, %v2717_v3 }
 0x2b9   : > { %v2108_v26 = vpop.f32.mrf.mxu2 }
 0x2ba   : > { %2786 = vst.msk [vmem:[%s4391_s6 + $0xa0] sm:$0xff] %vm2765_vm3, %v2753_v49  ;;  %v2162_v60 = vadd.f32 %v2108_v26, %v1883_v58  ;;  %v2386_v15 = vpop.f32.mrf.mxu3  ;;  %v2667_v34 = vpop.f32.mrf.mxu0 }
 0x2bc   : > { %v2440_v38 = vadd.f32 %v2386_v15, %v2162_v60 }
 0x2bd   : > { %v1835_v24 = vpop.f32.mrf.mxu1 }
 0x2be   : > { %v2718_v8 = vadd.f32 %v2664_v18, %v2440_v38  ;;  %v1885_v45 = vadd.f32 %v1835_v24, %v4286_v5 }
 0x2c0   : > { %v2754_v30 = vadd.f32 %v4380_v27, %v2718_v8 }
 0x2c1   : > { %v2111_v23 = vpop.f32.mrf.mxu2 }
 0x2c2   : > { %2787 = vst.msk [vmem:[%s4391_s6 + $0xa8] sm:$0xff] %vm2765_vm3, %v2754_v30  ;;  %v2163_v52 = vadd.f32 %v2111_v23, %v1884_v1  ;;  %v2389_v12 = vpop.f32.mrf.mxu3  ;;  %v2670_v10 = vpop.f32.mrf.mxu0 }
 0x2c4   : > { %v2441_v37 = vadd.f32 %v2389_v12, %v2163_v52 }
 0x2c5   : > { %v1838_v57 = vpop.f32.mrf.mxu1 }
 0x2c6   : > { %v2719_v42 = vadd.f32 %v2667_v34, %v2441_v37  ;;  %v1886_v47 = vadd.f32 %v1838_v57, %v4296_v25 }
 0x2c8   : > { %v2755_v9 = vadd.f32 %v4380_v27, %v2719_v42 }
 0x2c9   : > { %v2114_v40 = vpop.f32.mrf.mxu2 }
 0x2ca   : > { %2788 = vst.msk [vmem:[%s4391_s6 + $0xb0] sm:$0xff] %vm2765_vm3, %v2755_v9  ;;  %v2164_v20 = vadd.f32 %v2114_v40, %v1885_v45  ;;  %v2392_v48 = vpop.f32.mrf.mxu3  ;;  %v2673_v28 = vpop.f32.mrf.mxu0 }
 0x2cc   : > { %v2442_v59 = vadd.f32 %v2392_v48, %v2164_v20 }
 0x2cd   : > { %v1841_v61 = vpop.f32.mrf.mxu1 }
 0x2ce   : > { %v2720_v19 = vadd.f32 %v2670_v10, %v2442_v59  ;;  %v1887_v35 = vadd.f32 %v1841_v61, %v4306_v32 }
 0x2d0   : > { %v2756_v41 = vadd.f32 %v4380_v27, %v2720_v19 }
 0x2d1   : > { %v2117_v50 = vpop.f32.mrf.mxu2 }
 0x2d2   : > { %2789 = vst.msk [vmem:[%s4391_s6 + $0xb8] sm:$0xff] %vm2765_vm3, %v2756_v41  ;;  %v2165_v5 = vadd.f32 %v2117_v50, %v1886_v47  ;;  %v2395_v51 = vpop.f32.mrf.mxu3  ;;  %v2676_v7 = vpop.f32.mrf.mxu0 }
 0x2d4   : > { %v2443_v33 = vadd.f32 %v2395_v51, %v2165_v5 }
 0x2d5   : > { %v1844_v43 = vpop.f32.mrf.mxu1 }
 0x2d6   : > { %v2721_v31 = vadd.f32 %v2673_v28, %v2443_v33  ;;  %v1888_v44 = vadd.f32 %v1844_v43, %v4316_v56 }
 0x2d8   : > { %v2757_v0 = vadd.f32 %v4380_v27, %v2721_v31 }
 0x2d9   : > { %v2120_v16 = vpop.f32.mrf.mxu2 }
 0x2da   : > { %2790 = vst.msk [vmem:[%s4391_s6 + $0xc0] sm:$0xff] %vm2765_vm3, %v2757_v0  ;;  %v2166_v25 = vadd.f32 %v2120_v16, %v1887_v35  ;;  %v2398_v46 = vpop.f32.mrf.mxu3  ;;  %v2679_v2 = vpop.f32.mrf.mxu0 }
 0x2dc   : > { %v2444_v54 = vadd.f32 %v2398_v46, %v2166_v25 }
 0x2dd   : > { %v1847_v21 = vpop.f32.mrf.mxu1 }
 0x2de   : > { %v2722_v29 = vadd.f32 %v2676_v7, %v2444_v54  ;;  %v1889_v4 = vadd.f32 %v1847_v21, %v4326_v22 }
 0x2e0   : > { %v2758_v11 = vadd.f32 %v4380_v27, %v2722_v29 }
 0x2e1   : > { %v2123_v63 = vpop.f32.mrf.mxu2 }
 0x2e2   : > { %2791 = vst.msk [vmem:[%s4391_s6 + $0xc8] sm:$0xff] %vm2765_vm3, %v2758_v11  ;;  %v2167_v32 = vadd.f32 %v2123_v63, %v1888_v44  ;;  %v2401_v13 = vpop.f32.mrf.mxu3  ;;  %v2682_v39 = vpop.f32.mrf.mxu0 }
 0x2e4   : > { %v2445_v53 = vadd.f32 %v2401_v13, %v2167_v32 }
 0x2e5   : > { %v1850_v18 = vpop.f32.mrf.mxu1 }
 0x2e6   : > { %v2723_v62 = vadd.f32 %v2679_v2, %v2445_v53  ;;  %v1890_v15 = vadd.f32 %v1850_v18, %v4336_v6 }
 0x2e8   : > { %v2759_v36 = vadd.f32 %v4380_v27, %v2723_v62 }
 0x2e9   : > { %v2126_v3 = vpop.f32.mrf.mxu2 }
 0x2ea   : > { %2792 = vst.msk [vmem:[%s4391_s6 + $0xd0] sm:$0xff] %vm2765_vm3, %v2759_v36  ;;  %v2168_v56 = vadd.f32 %v2126_v3, %v1889_v4  ;;  %v2404_v58 = vpop.f32.mrf.mxu3  ;;  %v2685_v26 = vpop.f32.mrf.mxu0 }
 0x2ec   : > { %v2446_v49 = vadd.f32 %v2404_v58, %v2168_v56 }
 0x2ed   : > { %v1853_v24 = vpop.f32.mrf.mxu1 }
 0x2ee   : > { %v2724_v60 = vadd.f32 %v2682_v39, %v2446_v49  ;;  %v1891_v52 = vadd.f32 %v1853_v24, %v4346_v55 }
 0x2f0   : > { %v2760_v34 = vadd.f32 %v4380_v27, %v2724_v60 }
 0x2f1   : > { %v2129_v38 = vpop.f32.mrf.mxu2 }
 0x2f2   : > { %2793 = vst.msk [vmem:[%s4391_s6 + $0xd8] sm:$0xff] %vm2765_vm3, %v2760_v34  ;;  %v2169_v22 = vadd.f32 %v2129_v38, %v1890_v15  ;;  %v2407_v8 = vpop.f32.mrf.mxu3  ;;  %v2688_v23 = vpop.f32.mrf.mxu0 }
 0x2f4   : > { %v2447_v1 = vadd.f32 %v2407_v8, %v2169_v22 }
 0x2f5   : > { %v1856_v57 = vpop.f32.mrf.mxu1 }
 0x2f6   : > { %v2725_v30 = vadd.f32 %v2685_v26, %v2447_v1  ;;  %v1892_v9 = vadd.f32 %v1856_v57, %v4356_v14 }
 0x2f8   : > { %v2761_v12 = vadd.f32 %v4380_v27, %v2725_v30 }
 0x2f9   : > { %v2132_v10 = vpop.f32.mrf.mxu2 }
 0x2fa   : > { %2794 = vst.msk [vmem:[%s4391_s6 + $0xe0] sm:$0xff] %vm2765_vm3, %v2761_v12  ;;  %v2170_v6 = vadd.f32 %v2132_v10, %v1891_v52  ;;  %v2410_v37 = vpop.f32.mrf.mxu3  ;;  %v2691_v48 = vpop.f32.mrf.mxu0 }
 0x2fc   : > { %v2448_v42 = vadd.f32 %v2410_v37, %v2170_v6 }
 0x2fd   : > { %v1859_v61 = vpop.f32.mrf.mxu1 }
 0x2fe   : > { %v2726_v45 = vadd.f32 %v2688_v23, %v2448_v42  ;;  %v1893_v47 = vadd.f32 %v1859_v61, %v4366_v17 }
 0x300   : > { %v2762_v40 = vadd.f32 %v4380_v27, %v2726_v45 }
 0x301   : > { %v2135_v20 = vpop.f32.mrf.mxu2 }
 0x302   : > { %2795 = vst.msk [vmem:[%s4391_s6 + $0xe8] sm:$0xff] %vm2765_vm3, %v2762_v40  ;;  %v2171_v55 = vadd.f32 %v2135_v20, %v1892_v9  ;;  %v2413_v28 = vpop.f32.mrf.mxu3  ;;  %v2694_v51 = vpop.f32.mrf.mxu0 }
 0x304   : > { %v2449_v59 = vadd.f32 %v2413_v28, %v2171_v55 }
 0x306   : > { %v2727_v19 = vadd.f32 %v2691_v48, %v2449_v59 }
 0x308   : > { %v2763_v41 = vadd.f32 %v4380_v27, %v2727_v19 }
 0x309   : > { %v2138_v14 = vpop.f32.mrf.mxu2 }
 0x30a   : > { %2796 = vst.msk [vmem:[%s4391_s6 + $0xf0] sm:$0xff] %vm2765_vm3, %v2763_v41  ;;  %v2172_v50 = vadd.f32 %v2138_v14, %v1893_v47  ;;  %v2416_v5 = vpop.f32.mrf.mxu3 }
 0x30c   : > { %v2450_v7 = vadd.f32 %v2416_v5, %v2172_v50 }
 0x30e   : > { %v2728_v33 = vadd.f32 %v2694_v51, %v2450_v7 }
 0x310   : > { %v2764_v17 = vadd.f32 %v4380_v27, %v2728_v33 }
 0x312   : > { %2797 = vst.msk [vmem:[%s4391_s6 + $0xf8] sm:$0xff] %vm2765_vm3, %v2764_v17 }
 0x313   : > { %3268 = shalt.err (!%p3265_p3)
}
 0x314   : > { %s3306_s29 = smov 128   ;;  %s3307_s30 = smov 8  }
 0x315   : > { %3198 = dma.vmem_to_hbm [thread:$0]  (%p3366_p5), %s2812_s11, 4096, %s2814_s16, %s2799_s17, %s3306_s29, %s3306_s29, %s3307_s30  }
 0x316 PF: > { %p3204_p4 = scmp.ge.s32.totalorder %s3303_s15, 2  ;;  %s2828_s4 = sand.u32 1, %s3291_s12  }
 0x317   : > { %s2829_s5 = scalar_lea.sflag [#allocation4], %s2828_s4 }
 0x318   : > { %p3201_p7 = pnand %p3204_p4, %p3370_p6 }
 0x31a   : > { %p3202_p8 = pneg %p3201_p7 }
 0x31c   : > { %3286 = dma.done.wait (%p3202_p8), %s2829_s5, 4096  }
 0x31d   : > { %3288 = vsyncadd (%p3202_p8), %s2829_s5, 4294963200  ;;  %p13_p9 = scmp.ge.s32.totalorder %s3353_s18, 4   ;;  %s4768_s12 = smov %s3295_s13 }
 0x31e   : > { %s4769_s13 = smov %s3299_s14  ;;  %s4770_s14 = smov %s3364_s21 }
 0x31f   : > { %s4771_s15 = smov %s3353_s18  ;;  %15 = sbr.rel (!%p13_p9) target bundleno = 3 (0x3), region = 77 }
 0x324   :  { %2835 = vsyncpa [#allocation4], 1 }
 0x325   :  { %2837 = vsyncpa [#allocation4 + $0x1], 1 }

</bundles_post_ra>
